<compile_context>
chip_gen: v7x
topology: tpu7x:2x2x1
jax: 0.10.0
libtpu: 0.0.40
codegen_flags: <defaults>
</compile_context>

<pallas_src>
import functools

import jax
import jax.numpy as jnp
from jax.experimental import pallas as pl
from jax.experimental.pallas import tpu as pltpu


# Flip to jnp.bfloat16 for native-bf16 MXU gather/scatter (loosen the test
# tolerance accordingly); float32 keeps exact eval-mode semantics.
_MSG_DTYPE = jnp.float32


def _round_up(x, m):
    return ((x + m - 1) // m) * m


def _pad2(a, rows, cols):
    a = jnp.asarray(a, jnp.float32)
    return jnp.zeros((rows, cols), jnp.float32).at[: a.shape[0], : a.shape[1]].set(a)


def _pick_vmem_limit():
    """Generation-aware scoped-VMEM budget (~75% of physical, <= 96 MiB)."""
    cap = 128 * 1024 * 1024
    try:
        info = pltpu.get_tpu_info()
        cap = int(getattr(info, "vmem_capacity_bytes", cap) or cap)
    except Exception:
        pass
    return int(min(cap * 3 // 4, 96 * 1024 * 1024))


def _choose_edge_tiling(num_edges):
    """Return (Ep, e_tile). Single chunk for small E; 512-edge chunks else.

    e_tile is a multiple of 128 when tiling (so the [1, e_tile] tgt block is
    lane-aligned) or equal to the full padded extent for a single chunk.
    """
    if num_edges <= 512:
        ep = max(_round_up(num_edges, 8), 8)
        return ep, ep
    e_tile = 512
    return _round_up(num_edges, e_tile), e_tile


# ----------------------------------------------------------------------------
# Fused GIN + virtual-node layer kernel.
#   grid = (num_edge_chunks,)  -- 'arbitrary' reduction axis.
#   step 0    : h_in = h + vnode[batch]   (VMEM scratch), zero agg accumulator
#   every step: edge-encode chunk, gather x_j, msg=relu(x_j+e), scatter-add
#   last step : GIN MLP (+folded BNs), pooled = segment_sum(h_in), vnode MLP
# ----------------------------------------------------------------------------
def _gin_vnode_layer_kernel(apply_out_relu, do_vnode,
                            eps_ref,                    # SMEM (1, 1)
                            h_ref,                      # [Np, Dp]
                            vnode_ref,                  # [Gp, Dp]
                            bcol_ref,                   # [Np, 1] i32
                            brow_ref,                   # [1, Np] i32
                            src_ref,                    # [TE, 1] i32 (chunk)
                            tgtrow_ref,                 # [1, TE] i32 (chunk)
                            eattr_ref,                  # [TE, Fp]    (chunk)
                            ew_ref, eb_ref,             # [Fp, Dp], [1, Dp]
                            w1_ref, b1_ref,             # [Dp, Hp], [1, Hp]
                            w2_ref, b2_ref,             # [Hp, Dp], [1, Dp]
                            vw1_ref, vb1_ref,           # [Dp, Hp], [1, Hp]
                            vw2_ref, vb2_ref,           # [Hp, Dp], [1, Dp]
                            hout_ref, vout_ref,         # [Np, Dp], [Gp, Dp]
                            hin_s, agg_s):              # VMEM scratch [Np, Dp]
    step = pl.program_id(0)
    nsteps = pl.num_programs(0)
    np_ = h_ref.shape[0]
    gp = vnode_ref.shape[0]
    te = src_ref.shape[0]

    # ---- init (first edge chunk): vnode broadcast-add + zero accumulator ----
    @pl.when(step == 0)
    def _init():
        g_ids = jax.lax.broadcasted_iota(jnp.int32, (np_, gp), 1)
        b_oh = (g_ids == bcol_ref[...]).astype(jnp.float32)          # [Np, Gp]
        hin_s[...] = h_ref[...] + jnp.dot(
            b_oh, vnode_ref[...], preferred_element_type=jnp.float32)
        agg_s[...] = jnp.zeros_like(agg_s)

    # ---- every chunk: fused edge encode + gather + message + scatter-add ----
    h_in = hin_s[...]
    e_emb = jnp.dot(eattr_ref[...], ew_ref[...],
                    preferred_element_type=jnp.float32) + eb_ref[...]  # [TE,Dp]

    col_ids = jax.lax.broadcasted_iota(jnp.int32, (te, np_), 1)
    gather_oh = (col_ids == src_ref[...]).astype(_MSG_DTYPE)           # [TE,Np]
    x_j = jnp.dot(gather_oh, h_in.astype(_MSG_DTYPE),
                  preferred_element_type=jnp.float32)                  # [TE,Dp]

    msg = jnp.maximum(x_j + e_emb, 0.0)                                # [TE,Dp]

    row_ids = jax.lax.broadcasted_iota(jnp.int32, (np_, te), 0)
    scatter_oh = (row_ids == tgtrow_ref[...]).astype(_MSG_DTYPE)       # [Np,TE]
    agg_s[...] += jnp.dot(scatter_oh, msg.astype(_MSG_DTYPE),
                          preferred_element_type=jnp.float32)          # [Np,Dp]

    # ---- finalize (last edge chunk): MLP + pooling + vnode MLP --------------
    @pl.when(step == nsteps - 1)
    def _finalize():
        scale = 1.0 + eps_ref[0, 0]
        z = scale * hin_s[...] + agg_s[...]
        z1 = jnp.maximum(
            jnp.dot(z, w1_ref[...], preferred_element_type=jnp.float32)
            + b1_ref[...], 0.0)
        h_out = (jnp.dot(z1, w2_ref[...], preferred_element_type=jnp.float32)
                 + b2_ref[...])
        if apply_out_relu:
            h_out = jnp.maximum(h_out, 0.0)
        # padded node rows have batch == -1 -> force them to exactly zero
        valid = (bcol_ref[...] >= 0).astype(jnp.float32)               # [Np,1]
        hout_ref[...] = h_out * valid

        if do_vnode:
            g_rows = jax.lax.broadcasted_iota(jnp.int32, (gp, np_), 0)
            pool_oh = (g_rows == brow_ref[...]).astype(jnp.float32)    # [Gp,Np]
            pooled = jnp.dot(pool_oh, hin_s[...],
                             preferred_element_type=jnp.float32)       # [Gp,Dp]
            v = pooled + vnode_ref[...]
            t = jnp.maximum(
                jnp.dot(v, vw1_ref[...], preferred_element_type=jnp.float32)
                + vb1_ref[...], 0.0)
            # padded graph rows carry bias-only garbage but are never selected
            # by any real node's batch id, so they cannot leak.
            vout_ref[...] = jnp.maximum(
                jnp.dot(t, vw2_ref[...], preferred_element_type=jnp.float32)
                + vb2_ref[...], 0.0)
        else:
            vout_ref[...] = vnode_ref[...]


def fused_gin_vnode_layer(eps, h, vnode, batch_col, batch_row,
                          src_col, tgt_row, eattr,
                          ew, eb, w1, b1, w2, b2, vw1, vb1, vw2, vb2,
                          *, e_tile, apply_out_relu, do_vnode,
                          vmem_limit_bytes):
    Np, Dp = h.shape
    Gp = vnode.shape[0]
    Ep = src_col.shape[0]
    Fp = eattr.shape[1]
    Hp = w1.shape[1]
    n_chunks = Ep // e_tile

    kernel = functools.partial(_gin_vnode_layer_kernel, apply_out_relu, do_vnode)
    return pl.pallas_call(
        kernel,
        out_shape=(
            jax.ShapeDtypeStruct((Np, Dp), jnp.float32),
            jax.ShapeDtypeStruct((Gp, Dp), jnp.float32),
        ),
        grid=(n_chunks,),
        in_specs=[
            pl.BlockSpec(memory_space=pltpu.MemorySpace.SMEM),        # eps
            pl.BlockSpec((Np, Dp), lambda i: (0, 0)),                 # h (resident)
            pl.BlockSpec((Gp, Dp), lambda i: (0, 0)),                 # vnode
            pl.BlockSpec((Np, 1), lambda i: (0, 0)),                  # batch (col)
            pl.BlockSpec((1, Np), lambda i: (0, 0)),                  # batch (row)
            pl.BlockSpec((e_tile, 1), lambda i: (i, 0)),              # src chunk
            pl.BlockSpec((1, e_tile), lambda i: (0, i)),              # tgt chunk
            pl.BlockSpec((e_tile, Fp), lambda i: (i, 0)),             # edge_attr chunk
            pl.BlockSpec((Fp, Dp), lambda i: (0, 0)),                 # edge enc W
            pl.BlockSpec((1, Dp), lambda i: (0, 0)),                  # edge enc b
            pl.BlockSpec((Dp, Hp), lambda i: (0, 0)),                 # mlp W1 (BN folded)
            pl.BlockSpec((1, Hp), lambda i: (0, 0)),
            pl.BlockSpec((Hp, Dp), lambda i: (0, 0)),                 # mlp W2 (+outer BN)
            pl.BlockSpec((1, Dp), lambda i: (0, 0)),
            pl.BlockSpec((Dp, Hp), lambda i: (0, 0)),                 # vnode mlp W1
            pl.BlockSpec((1, Hp), lambda i: (0, 0)),
            pl.BlockSpec((Hp, Dp), lambda i: (0, 0)),                 # vnode mlp W2
            pl.BlockSpec((1, Dp), lambda i: (0, 0)),
        ],
        out_specs=(
            pl.BlockSpec((Np, Dp), lambda i: (0, 0)),
            pl.BlockSpec((Gp, Dp), lambda i: (0, 0)),
        ),
        scratch_shapes=[
            pltpu.VMEM((Np, Dp), jnp.float32),   # h_in (vnode-augmented input)
            pltpu.VMEM((Np, Dp), jnp.float32),   # agg accumulator
        ],
        compiler_params=pltpu.CompilerParams(
            dimension_semantics=("arbitrary",),
            vmem_limit_bytes=vmem_limit_bytes,
        ),
    )(eps, h, vnode, batch_col, batch_row, src_col, tgt_row, eattr,
      ew, eb, w1, b1, w2, b2, vw1, vb1, vw2, vb2)


# ----------------------------------------------------------------------------
# Deterministic parameter init (shapes follow the PyTorch module __init__);
# eval-mode BatchNorms are folded into the adjacent Linear weights.
# ----------------------------------------------------------------------------
def _lin_init(key, din, dout):
    k1, k2 = jax.random.split(key)
    bound = 1.0 / jnp.sqrt(jnp.float32(din))
    w = jax.random.uniform(k1, (din, dout), jnp.float32, -bound, bound)
    b = jax.random.uniform(k2, (dout,), jnp.float32, -bound, bound)
    return w, b


def _bn_affine(key, d, eps=1e-5):
    k1, k2, k3, k4 = jax.random.split(key, 4)
    gamma = 1.0 + 0.1 * jax.random.normal(k1, (d,), jnp.float32)
    beta = 0.1 * jax.random.normal(k2, (d,), jnp.float32)
    mean = 0.1 * jax.random.normal(k3, (d,), jnp.float32)
    var = jnp.abs(jax.random.normal(k4, (d,), jnp.float32)) + 0.5
    scale = gamma / jnp.sqrt(var + eps)
    shift = beta - mean * scale
    return scale, shift


def init_params(key, num_layer, emb_dim):
    keys = iter(jax.random.split(key, 1 + num_layer * 5 + (num_layer - 1) * 4))
    params = {
        "node_emb": jax.random.normal(next(keys), (1, emb_dim), jnp.float32),
        "vnode_emb": jnp.zeros((1, emb_dim), jnp.float32),   # constant_(0)
        "layers": [],
        "vmlps": [],
    }
    for _ in range(num_layer):
        edge_w, edge_b = _lin_init(next(keys), 7, emb_dim)
        w1, b1 = _lin_init(next(keys), emb_dim, 2 * emb_dim)
        s1, t1 = _bn_affine(next(keys), 2 * emb_dim)       # BN inside GIN MLP
        w2, b2 = _lin_init(next(keys), 2 * emb_dim, emb_dim)
        so, to = _bn_affine(next(keys), emb_dim)           # outer batch_norms[layer]
        params["layers"].append(dict(
            edge_w=edge_w, edge_b=edge_b, eps=jnp.zeros((), jnp.float32),
            mlp_w1f=w1 * s1[None, :], mlp_b1f=b1 * s1 + t1,
            mlp_w2f=w2 * so[None, :], mlp_b2f=b2 * so + to,
        ))
    for _ in range(num_layer - 1):
        w1, b1 = _lin_init(next(keys), emb_dim, 2 * emb_dim)
        s1, t1 = _bn_affine(next(keys), 2 * emb_dim)
        w2, b2 = _lin_init(next(keys), 2 * emb_dim, emb_dim)
        s2, t2 = _bn_affine(next(keys), emb_dim)
        params["vmlps"].append(dict(
            w1f=w1 * s1[None, :], b1f=b1 * s1 + t1,
            w2f=w2 * s2[None, :], b2f=b2 * s2 + t2,
        ))
    return params


# ----------------------------------------------------------------------------
# Forward pass: lane/sublane-friendly padding, ONE Pallas launch per layer.
# ----------------------------------------------------------------------------
def gnn_node_virtualnode_forward(params, x, edge_index, edge_attr, batch,
                                 num_graphs, num_layer):
    N = int(x.shape[0])
    E = int(edge_attr.shape[0])
    F = int(edge_attr.shape[1])
    D = int(params["node_emb"].shape[1])
    H = 2 * D
    G = int(num_graphs)

    Dp, Hp = _round_up(D, 128), _round_up(H, 128)
    Np = _round_up(N, 8)
    Gp = max(_round_up(G, 8), 8)
    Fp = max(_round_up(F, 8), 8)
    Ep, e_tile = _choose_edge_tiling(E)
    vmem_limit = _pick_vmem_limit()

    src = edge_index[0].astype(jnp.int32)
    tgt = edge_index[1].astype(jnp.int32)

    # Padded index vectors use -1 so padded edges / node rows match nothing.
    src_col = jnp.full((Ep, 1), -1, jnp.int32).at[:E, 0].set(src)
    tgt_row = jnp.full((1, Ep), -1, jnp.int32).at[0, :E].set(tgt)
    batch_i = batch.astype(jnp.int32)
    batch_col = jnp.full((Np, 1), -1, jnp.int32).at[:N, 0].set(batch_i)
    batch_row = jnp.full((1, Np), -1, jnp.int32).at[0, :N].set(batch_i)

    eattr_p = _pad2(edge_attr, Ep, Fp)

    # Pad per-layer weights once (zero padding is exact for the forward pass).
    lw = []
    for l in range(num_layer):
        p = params["layers"][l]
        lw.append(dict(
            eps=jnp.asarray(p["eps"], jnp.float32).reshape(1, 1),
            ew=_pad2(p["edge_w"], Fp, Dp),
            eb=_pad2(p["edge_b"][None, :], 1, Dp),
            w1=_pad2(p["mlp_w1f"], Dp, Hp), b1=_pad2(p["mlp_b1f"][None, :], 1, Hp),
            w2=_pad2(p["mlp_w2f"], Hp, Dp), b2=_pad2(p["mlp_b2f"][None, :], 1, Dp),
        ))
    vw = []
    for l in range(num_layer - 1):
        p = params["vmlps"][l]
        vw.append(dict(
            w1=_pad2(p["w1f"], Dp, Hp), b1=_pad2(p["b1f"][None, :], 1, Hp),
            w2=_pad2(p["w2f"], Hp, Dp), b2=_pad2(p["b2f"][None, :], 1, Dp),
        ))

    h = _pad2(params["node_emb"][x], Np, Dp)                          # [Np, Dp]
    vnode = _pad2(params["vnode_emb"][jnp.zeros((G,), jnp.int32)], Gp, Dp)

    for layer in range(num_layer):
        w = lw[layer]
        do_vnode = layer < num_layer - 1
        v = vw[layer] if do_vnode else vw[0]     # dummy weights when unused
        h, vnode = fused_gin_vnode_layer(
            w["eps"], h, vnode, batch_col, batch_row, src_col, tgt_row, eattr_p,
            w["ew"], w["eb"], w["w1"], w["b1"], w["w2"], w["b2"],
            v["w1"], v["b1"], v["w2"], v["b2"],
            e_tile=e_tile, apply_out_relu=do_vnode, do_vnode=do_vnode,
            vmem_limit_bytes=vmem_limit,
        )

    return h[:N, :D]   # JK == 'last'


# ----------------------------------------------------------------------------
# Pure-JAX reference (unpadded, f32) for correctness check
# ----------------------------------------------------------------------------
def reference_forward(params, x, edge_index, edge_attr, batch, num_graphs,
                      num_layer):
    N = x.shape[0]
    src, tgt = edge_index[0], edge_index[1]
    h = params["node_emb"][x]
    vnode = params["vnode_emb"][jnp.zeros((num_graphs,), jnp.int32)]
    for layer in range(num_layer):
        p = params["layers"][layer]
        h_in = h + vnode[batch]
        e = edge_attr @ p["edge_w"] + p["edge_b"]
        msg = jnp.maximum(h_in[src] + e, 0.0)
        agg = jax.ops.segment_sum(msg, tgt, num_segments=N)
        z = (1.0 + p["eps"]) * h_in + agg
        z1 = jnp.maximum(z @ p["mlp_w1f"] + p["mlp_b1f"], 0.0)
        h_new = z1 @ p["mlp_w2f"] + p["mlp_b2f"]
        if layer != num_layer - 1:
            h_new = jnp.maximum(h_new, 0.0)
        if layer < num_layer - 1:
            vp = params["vmlps"][layer]
            vt = jax.ops.segment_sum(h_in, batch,
                                     num_segments=num_graphs) + vnode
            vt = jnp.maximum(vt @ vp["w1f"] + vp["b1f"], 0.0)
            vnode = jnp.maximum(vt @ vp["w2f"] + vp["b2f"], 0.0)
        h = h_new
    return h


# ----------------------------------------------------------------------------
if __name__ == "__main__":
    num_layer, emb_dim = 3, 32
    N, E, G = 12, 24, 2

    key = jax.random.PRNGKey(0)
    k1, k2, k3, k4, k5 = jax.random.split(key, 5)

    x = jnp.zeros((N,), jnp.int32)                          # Embedding(1, D) idx
    batch = jnp.array([0] * 6 + [1] * 6, jnp.int32)
    src0 = jax.random.randint(k1, (E // 2,), 0, 6)
    tgt0 = jax.random.randint(k2, (E // 2,), 0, 6)
    src1 = jax.random.randint(k3, (E // 2,), 6, 12)
    tgt1 = jax.random.randint(k4, (E // 2,), 6, 12)
    edge_index = jnp.stack(
        [jnp.concatenate([src0, src1]), jnp.concatenate([tgt0, tgt1])]
    ).astype(jnp.int32)                                     # [2, E]
    edge_attr = jax.random.normal(k5, (E, 7), jnp.float32)  # [E, 7]

    params = init_params(jax.random.PRNGKey(42), num_layer, emb_dim)

    out = gnn_node_virtualnode_forward(
        params, x, edge_index, edge_attr, batch, G, num_layer)
    out = jax.block_until_ready(out)

    ref = reference_forward(params, x, edge_index, edge_attr, batch, G, num_layer)
    tol = 1e-4 if _MSG_DTYPE == jnp.float32 else 5e-2
    assert out.shape == (N, emb_dim)
    assert jnp.allclose(out, ref, atol=tol, rtol=tol), "mismatch vs JAX reference"

    print("KERNEL_OK")
</pallas_src>

<mosaic_0001>
module attributes {stable_mosaic.version = 11 : i64} {
  func.func @_gin_vnode_layer_kernel(%arg0: i32, %arg1: memref<1x1xf32, #tpu.memory_space<smem>>, %arg2: memref<16x128xf32, #tpu.memory_space<vmem>>, %arg3: memref<8x128xf32, #tpu.memory_space<vmem>>, %arg4: memref<16x1xi32, #tpu.memory_space<vmem>>, %arg5: memref<1x16xi32, #tpu.memory_space<vmem>>, %arg6: memref<24x1xi32, #tpu.memory_space<vmem>>, %arg7: memref<1x24xi32, #tpu.memory_space<vmem>>, %arg8: memref<24x8xf32, #tpu.memory_space<vmem>>, %arg9: memref<8x128xf32, #tpu.memory_space<vmem>>, %arg10: memref<1x128xf32, #tpu.memory_space<vmem>>, %arg11: memref<128x128xf32, #tpu.memory_space<vmem>>, %arg12: memref<1x128xf32, #tpu.memory_space<vmem>>, %arg13: memref<128x128xf32, #tpu.memory_space<vmem>>, %arg14: memref<1x128xf32, #tpu.memory_space<vmem>>, %arg15: memref<128x128xf32, #tpu.memory_space<vmem>>, %arg16: memref<1x128xf32, #tpu.memory_space<vmem>>, %arg17: memref<128x128xf32, #tpu.memory_space<vmem>>, %arg18: memref<1x128xf32, #tpu.memory_space<vmem>>, %arg19: memref<16x128xf32, #tpu.memory_space<vmem>>, %arg20: memref<8x128xf32, #tpu.memory_space<vmem>>, %arg21: memref<16x128xf32, #tpu.memory_space<vmem>>, %arg22: memref<16x128xf32, #tpu.memory_space<vmem>>) attributes {dimension_semantics = [#tpu.dimension_semantics<arbitrary>], iteration_bounds = array<i64: 1>, scalar_prefetch = 0 : i64, scratch_operands = 2 : i64, tpu.core_type = #tpu.core_type<tc>, window_params = [{transform_indices = @transform_0, window_bounds = array<i64: 1, 1>}, {pipeline_mode = #tpu.pipeline_mode<synchronous>, transform_indices = @transform_1, window_bounds = array<i64: 16, 128>}, {pipeline_mode = #tpu.pipeline_mode<synchronous>, transform_indices = @transform_2, window_bounds = array<i64: 8, 128>}, {pipeline_mode = #tpu.pipeline_mode<synchronous>, transform_indices = @transform_3, window_bounds = array<i64: 16, 1>}, {pipeline_mode = #tpu.pipeline_mode<synchronous>, transform_indices = @transform_4, window_bounds = array<i64: 1, 16>}, {transform_indices = @transform_5, window_bounds = array<i64: 24, 1>}, {transform_indices = @transform_6, window_bounds = array<i64: 1, 24>}, {transform_indices = @transform_7, window_bounds = array<i64: 24, 8>}, {pipeline_mode = #tpu.pipeline_mode<synchronous>, transform_indices = @transform_8, window_bounds = array<i64: 8, 128>}, {pipeline_mode = #tpu.pipeline_mode<synchronous>, transform_indices = @transform_9, window_bounds = array<i64: 1, 128>}, {pipeline_mode = #tpu.pipeline_mode<synchronous>, transform_indices = @transform_10, window_bounds = array<i64: 128, 128>}, {pipeline_mode = #tpu.pipeline_mode<synchronous>, transform_indices = @transform_11, window_bounds = array<i64: 1, 128>}, {pipeline_mode = #tpu.pipeline_mode<synchronous>, transform_indices = @transform_12, window_bounds = array<i64: 128, 128>}, {pipeline_mode = #tpu.pipeline_mode<synchronous>, transform_indices = @transform_13, window_bounds = array<i64: 1, 128>}, {pipeline_mode = #tpu.pipeline_mode<synchronous>, transform_indices = @transform_14, window_bounds = array<i64: 128, 128>}, {pipeline_mode = #tpu.pipeline_mode<synchronous>, transform_indices = @transform_15, window_bounds = array<i64: 1, 128>}, {pipeline_mode = #tpu.pipeline_mode<synchronous>, transform_indices = @transform_16, window_bounds = array<i64: 128, 128>}, {pipeline_mode = #tpu.pipeline_mode<synchronous>, transform_indices = @transform_17, window_bounds = array<i64: 1, 128>}, {pipeline_mode = #tpu.pipeline_mode<synchronous>, transform_indices = @transform_18, window_bounds = array<i64: 16, 128>}, {pipeline_mode = #tpu.pipeline_mode<synchronous>, transform_indices = @transform_19, window_bounds = array<i64: 8, 128>}]} {
    %c0_i32 = arith.constant 0 : i32
    %0 = arith.cmpi eq, %arg0, %c0_i32 : i32
    %1 = arith.extui %0 : i1 to i32
    %c0_i32_0 = arith.constant 0 : i32
    %2 = arith.cmpi ne, %1, %c0_i32_0 : i32
    scf.if %2 {
      %33 = tpu.iota {dimensions = array<i32: 1>} : vector<16x8xi32>
      %c0_21 = arith.constant 0 : index
      %c0_22 = arith.constant 0 : index
      %34 = vector.load %arg4[%c0_21, %c0_22] : memref<16x1xi32, #tpu.memory_space<vmem>>, vector<16x1xi32>
      %35 = vector.broadcast %34 : vector<16x1xi32> to vector<16x8xi32>
      %36 = arith.cmpi eq, %33, %35 : vector<16x8xi32>
      %37 = arith.extui %36 : vector<16x8xi1> to vector<16x8xi32>
      %38 = arith.sitofp %37 : vector<16x8xi32> to vector<16x8xf32>
      %c0_23 = arith.constant 0 : index
      %c0_24 = arith.constant 0 : index
      %39 = vector.load %arg2[%c0_23, %c0_24] : memref<16x128xf32, #tpu.memory_space<vmem>>, vector<16x128xf32>
      %c0_25 = arith.constant 0 : index
      %c0_26 = arith.constant 0 : index
      %40 = vector.load %arg3[%c0_25, %c0_26] : memref<8x128xf32, #tpu.memory_space<vmem>>, vector<8x128xf32>
      %cst_27 = arith.constant dense<0.000000e+00> : vector<16x128xf32>
      %41 = tpu.matmul %38, %40, %cst_27 {dimension_numbers = #tpu.dot_dimension_numbers<[1], [0], [0], [1], [0, 0, 1, 1], [], []>} : vector<16x8xf32>, vector<8x128xf32>, vector<16x128xf32> -> vector<16x128xf32>
      %42 = arith.addf %39, %41 : vector<16x128xf32>
      %c0_28 = arith.constant 0 : index
      %c0_29 = arith.constant 0 : index
      %43 = vector.load %arg21[%c0_28, %c0_29] : memref<16x128xf32, #tpu.memory_space<vmem>>, vector<16x128xf32>
      tpu.vector_store %arg21[%c0_28, %c0_29], %42 {strides = array<i32>} : memref<16x128xf32, #tpu.memory_space<vmem>>, vector<16x128xf32>,
      %cst_30 = arith.constant 0.000000e+00 : f32
      %44 = vector.broadcast %cst_30 : f32 to vector<16x128xf32>
      %c0_31 = arith.constant 0 : index
      %c0_32 = arith.constant 0 : index
      %45 = vector.load %arg22[%c0_31, %c0_32] : memref<16x128xf32, #tpu.memory_space<vmem>>, vector<16x128xf32>
      tpu.vector_store %arg22[%c0_31, %c0_32], %44 {strides = array<i32>} : memref<16x128xf32, #tpu.memory_space<vmem>>, vector<16x128xf32>,
    } else {
    }
    %c0 = arith.constant 0 : index
    %c0_1 = arith.constant 0 : index
    %3 = vector.load %arg21[%c0, %c0_1] : memref<16x128xf32, #tpu.memory_space<vmem>>, vector<16x128xf32>
    %c0_2 = arith.constant 0 : index
    %c0_3 = arith.constant 0 : index
    %4 = vector.load %arg8[%c0_2, %c0_3] : memref<24x8xf32, #tpu.memory_space<vmem>>, vector<24x8xf32>
    %c0_4 = arith.constant 0 : index
    %c0_5 = arith.constant 0 : index
    %5 = vector.load %arg9[%c0_4, %c0_5] : memref<8x128xf32, #tpu.memory_space<vmem>>, vector<8x128xf32>
    %cst = arith.constant dense<0.000000e+00> : vector<24x128xf32>
    %6 = tpu.matmul %4, %5, %cst {dimension_numbers = #tpu.dot_dimension_numbers<[1], [0], [0], [1], [0, 0, 1, 1], [], []>} : vector<24x8xf32>, vector<8x128xf32>, vector<24x128xf32> -> vector<24x128xf32>
    %c0_6 = arith.constant 0 : index
    %c0_7 = arith.constant 0 : index
    %7 = vector.load %arg10[%c0_6, %c0_7] : memref<1x128xf32, #tpu.memory_space<vmem>>, vector<1x128xf32>
    %8 = vector.broadcast %7 : vector<1x128xf32> to vector<24x128xf32>
    %9 = arith.addf %6, %8 : vector<24x128xf32>
    %10 = tpu.iota {dimensions = array<i32: 1>} : vector<24x16xi32>
    %c0_8 = arith.constant 0 : index
    %c0_9 = arith.constant 0 : index
    %11 = vector.load %arg6[%c0_8, %c0_9] : memref<24x1xi32, #tpu.memory_space<vmem>>, vector<24x1xi32>
    %12 = vector.broadcast %11 : vector<24x1xi32> to vector<24x16xi32>
    %13 = arith.cmpi eq, %10, %12 : vector<24x16xi32>
    %14 = arith.extui %13 : vector<24x16xi1> to vector<24x16xi32>
    %15 = arith.sitofp %14 : vector<24x16xi32> to vector<24x16xf32>
    %cst_10 = arith.constant dense<0.000000e+00> : vector<24x128xf32>
    %16 = tpu.matmul %15, %3, %cst_10 {dimension_numbers = #tpu.dot_dimension_numbers<[1], [0], [0], [1], [0, 0, 1, 1], [], []>} : vector<24x16xf32>, vector<16x128xf32>, vector<24x128xf32> -> vector<24x128xf32>
    %17 = arith.addf %16, %9 : vector<24x128xf32>
    %cst_11 = arith.constant 0.000000e+00 : f32
    %18 = vector.broadcast %cst_11 : f32 to vector<24x128xf32>
    %19 = arith.maximumf %17, %18 : vector<24x128xf32>
    %20 = tpu.iota {dimensions = array<i32: 0>} : vector<16x24xi32>
    %c0_12 = arith.constant 0 : index
    %c0_13 = arith.constant 0 : index
    %21 = vector.load %arg7[%c0_12, %c0_13] : memref<1x24xi32, #tpu.memory_space<vmem>>, vector<1x24xi32>
    %22 = vector.broadcast %21 : vector<1x24xi32> to vector<16x24xi32>
    %23 = arith.cmpi eq, %20, %22 : vector<16x24xi32>
    %24 = arith.extui %23 : vector<16x24xi1> to vector<16x24xi32>
    %25 = arith.sitofp %24 : vector<16x24xi32> to vector<16x24xf32>
    %c0_14 = arith.constant 0 : index
    %c0_15 = arith.constant 0 : index
    %26 = vector.load %arg22[%c0_14, %c0_15] : memref<16x128xf32, #tpu.memory_space<vmem>>, vector<16x128xf32>
    %cst_16 = arith.constant dense<0.000000e+00> : vector<16x128xf32>
    %27 = tpu.matmul %25, %19, %cst_16 {dimension_numbers = #tpu.dot_dimension_numbers<[1], [0], [0], [1], [0, 0, 1, 1], [], []>} : vector<16x24xf32>, vector<24x128xf32>, vector<16x128xf32> -> vector<16x128xf32>
    %28 = arith.addf %26, %27 : vector<16x128xf32>
    %c0_17 = arith.constant 0 : index
    %c0_18 = arith.constant 0 : index
    %29 = vector.load %arg22[%c0_17, %c0_18] : memref<16x128xf32, #tpu.memory_space<vmem>>, vector<16x128xf32>
    tpu.vector_store %arg22[%c0_17, %c0_18], %28 {strides = array<i32>} : memref<16x128xf32, #tpu.memory_space<vmem>>, vector<16x128xf32>,
    %c0_i32_19 = arith.constant 0 : i32
    %30 = arith.cmpi eq, %arg0, %c0_i32_19 : i32
    %31 = arith.extui %30 : i1 to i32
    %c0_i32_20 = arith.constant 0 : i32
    %32 = arith.cmpi ne, %31, %c0_i32_20 : i32
    scf.if %32 {
      %c0_21 = arith.constant 0 : index
      %c0_22 = arith.constant 0 : index
      %33 = memref.load %arg1[%c0_21, %c0_22] : memref<1x1xf32, #tpu.memory_space<smem>>
      %cst_23 = arith.constant 1.000000e+00 : f32
      %34 = arith.addf %cst_23, %33 : f32
      %c0_24 = arith.constant 0 : index
      %c0_25 = arith.constant 0 : index
      %35 = vector.load %arg21[%c0_24, %c0_25] : memref<16x128xf32, #tpu.memory_space<vmem>>, vector<16x128xf32>
      %36 = vector.broadcast %34 : f32 to vector<16x128xf32>
      %37 = arith.mulf %36, %35 : vector<16x128xf32>
      %c0_26 = arith.constant 0 : index
      %c0_27 = arith.constant 0 : index
      %38 = vector.load %arg22[%c0_26, %c0_27] : memref<16x128xf32, #tpu.memory_space<vmem>>, vector<16x128xf32>
      %39 = arith.addf %37, %38 : vector<16x128xf32>
      %c0_28 = arith.constant 0 : index
      %c0_29 = arith.constant 0 : index
      %40 = vector.load %arg11[%c0_28, %c0_29] : memref<128x128xf32, #tpu.memory_space<vmem>>, vector<128x128xf32>
      %cst_30 = arith.constant dense<0.000000e+00> : vector<16x128xf32>
      %41 = tpu.matmul %39, %40, %cst_30 {dimension_numbers = #tpu.dot_dimension_numbers<[1], [0], [0], [1], [0, 0, 1, 1], [], []>} : vector<16x128xf32>, vector<128x128xf32>, vector<16x128xf32> -> vector<16x128xf32>
      %c0_31 = arith.constant 0 : index
      %c0_32 = arith.constant 0 : index
      %42 = vector.load %arg12[%c0_31, %c0_32] : memref<1x128xf32, #tpu.memory_space<vmem>>, vector<1x128xf32>
      %43 = vector.broadcast %42 : vector<1x128xf32> to vector<16x128xf32>
      %44 = arith.addf %41, %43 : vector<16x128xf32>
      %cst_33 = arith.constant 0.000000e+00 : f32
      %45 = vector.broadcast %cst_33 : f32 to vector<16x128xf32>
      %46 = arith.maximumf %44, %45 : vector<16x128xf32>
      %c0_34 = arith.constant 0 : index
      %c0_35 = arith.constant 0 : index
      %47 = vector.load %arg13[%c0_34, %c0_35] : memref<128x128xf32, #tpu.memory_space<vmem>>, vector<128x128xf32>
      %cst_36 = arith.constant dense<0.000000e+00> : vector<16x128xf32>
      %48 = tpu.matmul %46, %47, %cst_36 {dimension_numbers = #tpu.dot_dimension_numbers<[1], [0], [0], [1], [0, 0, 1, 1], [], []>} : vector<16x128xf32>, vector<128x128xf32>, vector<16x128xf32> -> vector<16x128xf32>
      %c0_37 = arith.constant 0 : index
      %c0_38 = arith.constant 0 : index
      %49 = vector.load %arg14[%c0_37, %c0_38] : memref<1x128xf32, #tpu.memory_space<vmem>>, vector<1x128xf32>
      %50 = vector.broadcast %49 : vector<1x128xf32> to vector<16x128xf32>
      %51 = arith.addf %48, %50 : vector<16x128xf32>
      %cst_39 = arith.constant 0.000000e+00 : f32
      %52 = vector.broadcast %cst_39 : f32 to vector<16x128xf32>
      %53 = arith.maximumf %51, %52 : vector<16x128xf32>
      %c0_40 = arith.constant 0 : index
      %c0_41 = arith.constant 0 : index
      %54 = vector.load %arg4[%c0_40, %c0_41] : memref<16x1xi32, #tpu.memory_space<vmem>>, vector<16x1xi32>
      %c0_i32_42 = arith.constant 0 : i32
      %55 = vector.broadcast %c0_i32_42 : i32 to vector<16x1xi32>
      %56 = arith.cmpi sge, %54, %55 : vector<16x1xi32>
      %57 = arith.extui %56 : vector<16x1xi1> to vector<16x1xi32>
      %58 = arith.sitofp %57 : vector<16x1xi32> to vector<16x1xf32>
      %59 = vector.broadcast %58 : vector<16x1xf32> to vector<16x128xf32>
      %60 = arith.mulf %53, %59 : vector<16x128xf32>
      %c0_43 = arith.constant 0 : index
      %c0_44 = arith.constant 0 : index
      %61 = vector.load %arg19[%c0_43, %c0_44] : memref<16x128xf32, #tpu.memory_space<vmem>>, vector<16x128xf32>
      tpu.vector_store %arg19[%c0_43, %c0_44], %60 {strides = array<i32>} : memref<16x128xf32, #tpu.memory_space<vmem>>, vector<16x128xf32>,
      %62 = tpu.iota {dimensions = array<i32: 0>} : vector<8x16xi32>
      %c0_45 = arith.constant 0 : index
      %c0_46 = arith.constant 0 : index
      %63 = vector.load %arg5[%c0_45, %c0_46] : memref<1x16xi32, #tpu.memory_space<vmem>>, vector<1x16xi32>
      %64 = vector.broadcast %63 : vector<1x16xi32> to vector<8x16xi32>
      %65 = arith.cmpi eq, %62, %64 : vector<8x16xi32>
      %66 = arith.extui %65 : vector<8x16xi1> to vector<8x16xi32>
      %67 = arith.sitofp %66 : vector<8x16xi32> to vector<8x16xf32>
      %c0_47 = arith.constant 0 : index
      %c0_48 = arith.constant 0 : index
      %68 = vector.load %arg21[%c0_47, %c0_48] : memref<16x128xf32, #tpu.memory_space<vmem>>, vector<16x128xf32>
      %cst_49 = arith.constant dense<0.000000e+00> : vector<8x128xf32>
      %69 = tpu.matmul %67, %68, %cst_49 {dimension_numbers = #tpu.dot_dimension_numbers<[1], [0], [0], [1], [0, 0, 1, 1], [], []>} : vector<8x16xf32>, vector<16x128xf32>, vector<8x128xf32> -> vector<8x128xf32>
      %c0_50 = arith.constant 0 : index
      %c0_51 = arith.constant 0 : index
      %70 = vector.load %arg3[%c0_50, %c0_51] : memref<8x128xf32, #tpu.memory_space<vmem>>, vector<8x128xf32>
      %71 = arith.addf %69, %70 : vector<8x128xf32>
      %c0_52 = arith.constant 0 : index
      %c0_53 = arith.constant 0 : index
      %72 = vector.load %arg15[%c0_52, %c0_53] : memref<128x128xf32, #tpu.memory_space<vmem>>, vector<128x128xf32>
      %cst_54 = arith.constant dense<0.000000e+00> : vector<8x128xf32>
      %73 = tpu.matmul %71, %72, %cst_54 {dimension_numbers = #tpu.dot_dimension_numbers<[1], [0], [0], [1], [0, 0, 1, 1], [], []>} : vector<8x128xf32>, vector<128x128xf32>, vector<8x128xf32> -> vector<8x128xf32>
      %c0_55 = arith.constant 0 : index
      %c0_56 = arith.constant 0 : index
      %74 = vector.load %arg16[%c0_55, %c0_56] : memref<1x128xf32, #tpu.memory_space<vmem>>, vector<1x128xf32>
      %75 = vector.broadcast %74 : vector<1x128xf32> to vector<8x128xf32>
      %76 = arith.addf %73, %75 : vector<8x128xf32>
      %cst_57 = arith.constant 0.000000e+00 : f32
      %77 = vector.broadcast %cst_57 : f32 to vector<8x128xf32>
      %78 = arith.maximumf %76, %77 : vector<8x128xf32>
      %c0_58 = arith.constant 0 : index
      %c0_59 = arith.constant 0 : index
      %79 = vector.load %arg17[%c0_58, %c0_59] : memref<128x128xf32, #tpu.memory_space<vmem>>, vector<128x128xf32>
      %cst_60 = arith.constant dense<0.000000e+00> : vector<8x128xf32>
      %80 = tpu.matmul %78, %79, %cst_60 {dimension_numbers = #tpu.dot_dimension_numbers<[1], [0], [0], [1], [0, 0, 1, 1], [], []>} : vector<8x128xf32>, vector<128x128xf32>, vector<8x128xf32> -> vector<8x128xf32>
      %c0_61 = arith.constant 0 : index
      %c0_62 = arith.constant 0 : index
      %81 = vector.load %arg18[%c0_61, %c0_62] : memref<1x128xf32, #tpu.memory_space<vmem>>, vector<1x128xf32>
      %82 = vector.broadcast %81 : vector<1x128xf32> to vector<8x128xf32>
      %83 = arith.addf %80, %82 : vector<8x128xf32>
      %cst_63 = arith.constant 0.000000e+00 : f32
      %84 = vector.broadcast %cst_63 : f32 to vector<8x128xf32>
      %85 = arith.maximumf %83, %84 : vector<8x128xf32>
      %c0_64 = arith.constant 0 : index
      %c0_65 = arith.constant 0 : index
      %86 = vector.load %arg20[%c0_64, %c0_65] : memref<8x128xf32, #tpu.memory_space<vmem>>, vector<8x128xf32>
      tpu.vector_store %arg20[%c0_64, %c0_65], %85 {strides = array<i32>} : memref<8x128xf32, #tpu.memory_space<vmem>>, vector<8x128xf32>,
    } else {
    }
    return
  }
  func.func @transform_0(%arg0: i32) -> (i32, i32) {
    %c0_i32 = arith.constant 0 : i32
    %c0_i32_0 = arith.constant 0 : i32
    %c0_i32_1 = arith.constant 0 : i32
    return %c0_i32, %c0_i32_0 : i32, i32
  }
  func.func @transform_1(%arg0: i32) -> (i32, i32) {
    %c0_i32 = arith.constant 0 : i32
    %c0_i32_0 = arith.constant 0 : i32
    %c0_i32_1 = arith.constant 0 : i32
    return %c0_i32, %c0_i32_0 : i32, i32
  }
  func.func @transform_2(%arg0: i32) -> (i32, i32) {
    %c0_i32 = arith.constant 0 : i32
    %c0_i32_0 = arith.constant 0 : i32
    %c0_i32_1 = arith.constant 0 : i32
    return %c0_i32, %c0_i32_0 : i32, i32
  }
  func.func @transform_3(%arg0: i32) -> (i32, i32) {
    %c0_i32 = arith.constant 0 : i32
    %c0_i32_0 = arith.constant 0 : i32
    %c0_i32_1 = arith.constant 0 : i32
    return %c0_i32, %c0_i32_0 : i32, i32
  }
  func.func @transform_4(%arg0: i32) -> (i32, i32) {
    %c0_i32 = arith.constant 0 : i32
    %c0_i32_0 = arith.constant 0 : i32
    %c0_i32_1 = arith.constant 0 : i32
    return %c0_i32, %c0_i32_0 : i32, i32
  }
  func.func @transform_5(%arg0: i32) -> (i32, i32) {
    %c0_i32 = arith.constant 0 : i32
    %c0_i32_0 = arith.constant 0 : i32
    return %arg0, %c0_i32 : i32, i32
  }
  func.func @transform_6(%arg0: i32) -> (i32, i32) {
    %c0_i32 = arith.constant 0 : i32
    %c0_i32_0 = arith.constant 0 : i32
    return %c0_i32, %arg0 : i32, i32
  }
  func.func @transform_7(%arg0: i32) -> (i32, i32) {
    %c0_i32 = arith.constant 0 : i32
    %c0_i32_0 = arith.constant 0 : i32
    return %arg0, %c0_i32 : i32, i32
  }
  func.func @transform_8(%arg0: i32) -> (i32, i32) {
    %c0_i32 = arith.constant 0 : i32
    %c0_i32_0 = arith.constant 0 : i32
    %c0_i32_1 = arith.constant 0 : i32
    return %c0_i32, %c0_i32_0 : i32, i32
  }
  func.func @transform_9(%arg0: i32) -> (i32, i32) {
    %c0_i32 = arith.constant 0 : i32
    %c0_i32_0 = arith.constant 0 : i32
    %c0_i32_1 = arith.constant 0 : i32
    return %c0_i32, %c0_i32_0 : i32, i32
  }
  func.func @transform_10(%arg0: i32) -> (i32, i32) {
    %c0_i32 = arith.constant 0 : i32
    %c0_i32_0 = arith.constant 0 : i32
    %c0_i32_1 = arith.constant 0 : i32
    return %c0_i32, %c0_i32_0 : i32, i32
  }
  func.func @transform_11(%arg0: i32) -> (i32, i32) {
    %c0_i32 = arith.constant 0 : i32
    %c0_i32_0 = arith.constant 0 : i32
    %c0_i32_1 = arith.constant 0 : i32
    return %c0_i32, %c0_i32_0 : i32, i32
  }
  func.func @transform_12(%arg0: i32) -> (i32, i32) {
    %c0_i32 = arith.constant 0 : i32
    %c0_i32_0 = arith.constant 0 : i32
    %c0_i32_1 = arith.constant 0 : i32
    return %c0_i32, %c0_i32_0 : i32, i32
  }
  func.func @transform_13(%arg0: i32) -> (i32, i32) {
    %c0_i32 = arith.constant 0 : i32
    %c0_i32_0 = arith.constant 0 : i32
    %c0_i32_1 = arith.constant 0 : i32
    return %c0_i32, %c0_i32_0 : i32, i32
  }
  func.func @transform_14(%arg0: i32) -> (i32, i32) {
    %c0_i32 = arith.constant 0 : i32
    %c0_i32_0 = arith.constant 0 : i32
    %c0_i32_1 = arith.constant 0 : i32
    return %c0_i32, %c0_i32_0 : i32, i32
  }
  func.func @transform_15(%arg0: i32) -> (i32, i32) {
    %c0_i32 = arith.constant 0 : i32
    %c0_i32_0 = arith.constant 0 : i32
    %c0_i32_1 = arith.constant 0 : i32
    return %c0_i32, %c0_i32_0 : i32, i32
  }
  func.func @transform_16(%arg0: i32) -> (i32, i32) {
    %c0_i32 = arith.constant 0 : i32
    %c0_i32_0 = arith.constant 0 : i32
    %c0_i32_1 = arith.constant 0 : i32
    return %c0_i32, %c0_i32_0 : i32, i32
  }
  func.func @transform_17(%arg0: i32) -> (i32, i32) {
    %c0_i32 = arith.constant 0 : i32
    %c0_i32_0 = arith.constant 0 : i32
    %c0_i32_1 = arith.constant 0 : i32
    return %c0_i32, %c0_i32_0 : i32, i32
  }
  func.func @transform_18(%arg0: i32) -> (i32, i32) {
    %c0_i32 = arith.constant 0 : i32
    %c0_i32_0 = arith.constant 0 : i32
    %c0_i32_1 = arith.constant 0 : i32
    return %c0_i32, %c0_i32_0 : i32, i32
  }
  func.func @transform_19(%arg0: i32) -> (i32, i32) {
    %c0_i32 = arith.constant 0 : i32
    %c0_i32_0 = arith.constant 0 : i32
    %c0_i32_1 = arith.constant 0 : i32
    return %c0_i32, %c0_i32_0 : i32, i32
  }
}

</mosaic_0001>

<bundles_post_ra>
// kernel: tpu_custom_call.1
= control target key start
LH: loop header
LB: loop body
LE: loop exit
PB: predicated region body
PF: predicated region fallthrough
CT: control target
= control target key end

     0   :  { %s2653_s0 = inlined_call_operand.<no memory space> [shape: f32[1,1], index: 0, kind: input, shape index: {}]   ;;  %s2654_s1 = inlined_call_operand.hbm [shape: f32[16,128], index: 1, kind: input, shape index: {}]   ;;  %s2655_s2 = inlined_call_operand.hbm [shape: f32[8,128], index: 2, kind: input, shape index: {}]   ;;  %s2656_s3 = inlined_call_operand.hbm [shape: s32[16,1], index: 3, kind: input, shape index: {}]   ;;  %s2657_s4 = inlined_call_operand.hbm [shape: s32[1,16], index: 4, kind: input, shape index: {}]   ;;  %s2658_s5 = inlined_call_operand.hbm [shape: s32[24,1], index: 5, kind: input, shape index: {}]   ;;  %s2659_s6 = inlined_call_operand.hbm [shape: s32[1,24], index: 6, kind: input, shape index: {}]   ;;  %s2660_s7 = inlined_call_operand.hbm [shape: f32[24,8], index: 7, kind: input, shape index: {}]   ;;  %s2661_s8 = inlined_call_operand.hbm [shape: f32[8,128], index: 8, kind: input, shape index: {}]   ;;  %s2662_s9 = inlined_call_operand.hbm [shape: f32[1,128], index: 9, kind: input, shape index: {}]   ;;  %s2663_s10 = inlined_call_operand.hbm [shape: f32[128,128], index: 10, kind: input, shape index: {}]   ;;  %s2664_s11 = inlined_call_operand.hbm [shape: f32[1,128], index: 11, kind: input, shape index: {}]   ;;  %s2665_s12 = inlined_call_operand.hbm [shape: f32[128,128], index: 12, kind: input, shape index: {}]   ;;  %s2666_s13 = inlined_call_operand.hbm [shape: f32[1,128], index: 13, kind: input, shape index: {}]   ;;  %s2667_s14 = inlined_call_operand.hbm [shape: f32[128,128], index: 14, kind: input, shape index: {}]   ;;  %s2668_s15 = inlined_call_operand.hbm [shape: f32[1,128], index: 15, kind: input, shape index: {}]   ;;  %s2669_s16 = inlined_call_operand.hbm [shape: f32[128,128], index: 16, kind: input, shape index: {}]   ;;  %s2670_s17 = inlined_call_operand.hbm [shape: f32[1,128], index: 17, kind: input, shape index: {}]   ;;  %s2671_s18 = inlined_call_operand.hbm [shape: f32[16,128], index: 18, kind: output, shape index: {0}]   ;;  %s2672_s19 = inlined_call_operand.hbm [shape: f32[8,128], index: 19, kind: output, shape index: {1}]  }
   0x1   :  { %2676 = sst [smem:[#allocation46_spill]] %s2653_s0 }
   0x2   :  { %2677 = sst [smem:[#allocation47_spill]] %s2654_s1 }
   0x3   :  { %2678 = sst [smem:[#allocation48_spill]] %s2655_s2 }
   0x4   :  { %2679 = sst [smem:[#allocation49_spill]] %s2656_s3 }
   0x5   :  { %26 = vsyncpa [#allocation6], 0 }
   0x6   :  { %27 = vsyncpa [#allocation9], 0 }
   0x7   :  { %28 = vsyncpa [#allocation12], 0 }
   0x8   :  { %29 = vsyncpa [#allocation15], 0 }
   0x9   :  { %30 = vsyncpa [#allocation18], 0 }
   0xa   :  { %31 = vsyncpa [#allocation21], 0 }
   0xb   :  { %32 = vsyncpa [#allocation24], 0 }
   0xc   :  { %33 = vsyncpa [#allocation27], 0 }
   0xd   :  { %34 = vsyncpa [#allocation30], 0 }
   0xe   :  { %35 = vsyncpa [#allocation7], 0 }
   0xf   :  { %36 = vsyncpa [#allocation34], 0  ;;  %s2162_s0 = smov [#allocation8]   ;;  %s2163_s20 = smov [#allocation11]  }
  0x10   :  { %s57_s30 = sshll.u32 %s2162_s0, 4  ;;  %s79_s21 = sshll.u32 %s2163_s20, 4  ;;  %s58_s30 = int_to_ptr.vmem [resolvable:$true] %s57_s30  ;;  %s80_s21 = int_to_ptr.vmem [resolvable:$true] %s79_s21 }
  0x11   :  { %s2680_s2 = sld [smem:[#allocation48_spill]] }
  0x17   :  { %s1722_s23 = scalar_lea.hbm %s2680_s2, 128 }
  0x18   :  { %p1723_p0 = scmp.ne.s32.totalorder %s2680_s2, %s1722_s23  ;;  %p1726_p1 = scmp.lt.u32.totalorder %s1722_s23, %s2680_s2 }
  0x1a   :  { %p1728_p2 = pnand %p1726_p1, %p1723_p0 }
  0x1c   :  { %1731 = shalt.err (!%p1728_p2)
}
  0x1d   :  { %s1732_s27 = scalar_lea.vmem %s58_s30, 128  ;;  %p1737_p4 = scmp.lt.s32.totalorder %s58_s30, %s58_s30 }
  0x1e   :  { %p1733_p3 = scmp.ne.s32.totalorder %s58_s30, %s1732_s27  ;;  %p1738_p5 = scmp.lt.s32.totalorder %s1732_s27, %s1732_s27 }
  0x20   :  { %p1739_p6 = por %p1738_p5, %p1737_p4 }
  0x22   :  { %p1740_p7 = pnand %p1739_p6, %p1733_p3 }
  0x24   :  { %1743 = shalt.err (!%p1740_p7)
}
  0x25   :  { %60 = dma.hbm_to_vmem [thread:$0]  %s2680_s2, 128, %s58_s30, [#allocation9]  }
  0x26   :  { %s1744_s1 = scalar_lea.hbm %s2657_s4, 16 }
  0x27   :  { %p1745_p8 = scmp.ne.s32.totalorder %s2657_s4, %s1744_s1  ;;  %p1748_p9 = scmp.lt.u32.totalorder %s1744_s1, %s2657_s4 }
  0x29   :  { %p1750_p10 = pnand %p1748_p9, %p1745_p8 }
  0x2b   :  { %1753 = shalt.err (!%p1750_p10)
}
  0x2c   :  { %s1754_s3 = scalar_lea.vmem %s80_s21, 16  ;;  %s1758_s26 = scalar_lea.vmem %s80_s21, 32 }
  0x2d   :  { %p1755_p11 = scmp.ne.s32.totalorder %s80_s21, %s1754_s3  ;;  %p1759_p12 = scmp.lt.s32.totalorder %s80_s21, %s80_s21 }
  0x2e   :  { %p1760_p13 = scmp.lt.s32.totalorder %s1758_s26, %s1754_s3 }
  0x30   :  { %p1761_p0 = por %p1760_p13, %p1759_p12 }
  0x32   :  { %p1762_p1 = pnand %p1761_p0, %p1755_p11 }
  0x34   :  { %1765 = shalt.err (!%p1762_p1)
}
  0x35   :  { %82 = dma.hbm_to_vmem [thread:$0]  %s2657_s4, 16, %s80_s21, [#allocation12]  }
  0x36   :  { %s2164_s27 = smov [#allocation14]   ;;  %s2165_s29 = smov [#allocation17]  }
  0x37   :  { %s101_s28 = sshll.u32 %s2164_s27, 4  ;;  %s123_s0 = sshll.u32 %s2165_s29, 4  ;;  %s102_s28 = int_to_ptr.vmem [resolvable:$true] %s101_s28  ;;  %s124_s0 = int_to_ptr.vmem [resolvable:$true] %s123_s0 }
  0x38   :  { %s1766_s22 = scalar_lea.hbm %s2659_s6, 16 }
  0x39   :  { %p1767_p2 = scmp.ne.s32.totalorder %s2659_s6, %s1766_s22  ;;  %p1770_p3 = scmp.lt.u32.totalorder %s1766_s22, %s2659_s6 }
  0x3b   :  { %p1772_p4 = pnand %p1770_p3, %p1767_p2 }
  0x3d   :  { %1775 = shalt.err (!%p1772_p4)
}
  0x3e   :  { %s1776_s4 = scalar_lea.vmem %s102_s28, 16  ;;  %s1780_s21 = scalar_lea.vmem %s102_s28, 32 }
  0x3f   :  { %p1777_p5 = scmp.ne.s32.totalorder %s102_s28, %s1776_s4  ;;  %p1781_p6 = scmp.lt.s32.totalorder %s102_s28, %s102_s28 }
  0x40   :  { %p1782_p7 = scmp.lt.s32.totalorder %s1780_s21, %s1776_s4 }
  0x42   :  { %p1783_p8 = por %p1782_p7, %p1781_p6 }
  0x44   :  { %p1784_p9 = pnand %p1783_p8, %p1777_p5 }
  0x46   :  { %1787 = shalt.err (!%p1784_p9)
}
  0x47   :  { %104 = dma.hbm_to_vmem [thread:$0]  %s2659_s6, 16, %s102_s28, [#allocation15]  }
  0x48   :  { %s1788_s29 = scalar_lea.hbm %s2661_s8, 128 }
  0x49   :  { %p1789_p10 = scmp.ne.s32.totalorder %s2661_s8, %s1788_s29  ;;  %p1792_p11 = scmp.lt.u32.totalorder %s1788_s29, %s2661_s8 }
  0x4b   :  { %p1794_p12 = pnand %p1792_p11, %p1789_p10 }
  0x4d   :  { %1797 = shalt.err (!%p1794_p12)
}
  0x4e   :  { %s1798_s23 = scalar_lea.vmem %s124_s0, 128  ;;  %p1803_p0 = scmp.lt.s32.totalorder %s124_s0, %s124_s0 }
  0x4f   :  { %p1799_p13 = scmp.ne.s32.totalorder %s124_s0, %s1798_s23  ;;  %p1804_p1 = scmp.lt.s32.totalorder %s1798_s23, %s1798_s23 }
  0x51   :  { %p1805_p2 = por %p1804_p1, %p1803_p0 }
  0x53   :  { %p1806_p3 = pnand %p1805_p2, %p1799_p13 }
  0x55   :  { %1809 = shalt.err (!%p1806_p3)
}
  0x56   :  { %126 = dma.hbm_to_vmem [thread:$0]  %s2661_s8, 128, %s124_s0, [#allocation18]  }
  0x57   :  { %s2166_s25 = smov [#allocation20]   ;;  %s2167_s4 = smov [#allocation23]  }
  0x58   :  { %s142_s3 = sshll.u32 %s2166_s25, 4  ;;  %s164_s21 = sshll.u32 %s2167_s4, 4  ;;  %s143_s3 = int_to_ptr.vmem [resolvable:$true] %s142_s3  ;;  %s2335_s21 = int_to_ptr.vmem [resolvable:$true] %s164_s21 }
  0x59   :  { %s1810_s2 = scalar_lea.hbm %s2663_s10, 2048 }
  0x5a   :  { %p1811_p4 = scmp.ne.s32.totalorder %s2663_s10, %s1810_s2  ;;  %p1814_p5 = scmp.lt.u32.totalorder %s1810_s2, %s2663_s10 }
  0x5c   :  { %p1816_p6 = pnand %p1814_p5, %p1811_p4 }
  0x5e   :  { %1819 = shalt.err (!%p1816_p6)
}
  0x5f   :  { %s1820_s8 = scalar_lea.vmem %s143_s3, 2048  ;;  %p1825_p8 = scmp.lt.s32.totalorder %s143_s3, %s143_s3 }
  0x60   :  { %p1821_p7 = scmp.ne.s32.totalorder %s143_s3, %s1820_s8  ;;  %p1826_p9 = scmp.lt.s32.totalorder %s1820_s8, %s1820_s8 }
  0x62   :  { %p1827_p10 = por %p1826_p9, %p1825_p8 }
  0x64   :  { %p1828_p11 = pnand %p1827_p10, %p1821_p7 }
  0x66   :  { %1831 = shalt.err (!%p1828_p11)
}
  0x67   :  { %s2168_s0 = smov 128   ;;  %s2169_s22 = smov 8  }
  0x68   :  { %148 = dma.hbm_to_vmem [thread:$0]  %s2663_s10, 2048, %s143_s3, [#allocation21], %s2168_s0, %s2168_s0, %s2169_s22  }
  0x69   :  { %s1832_s25 = scalar_lea.hbm %s2665_s12, 2048 }
  0x6a   :  { %p1833_p12 = scmp.ne.s32.totalorder %s2665_s12, %s1832_s25  ;;  %p1836_p13 = scmp.lt.u32.totalorder %s1832_s25, %s2665_s12 }
  0x6c   :  { %p1838_p0 = pnand %p1836_p13, %p1833_p12 }
  0x6e   :  { %1841 = shalt.err (!%p1838_p0)
}
  0x6f   :  { %s1842_s27 = scalar_lea.vmem %s2335_s21, 2048  ;;  %p1847_p2 = scmp.lt.s32.totalorder %s2335_s21, %s2335_s21 }
  0x70   :  { %p1843_p1 = scmp.ne.s32.totalorder %s2335_s21, %s1842_s27  ;;  %p1848_p3 = scmp.lt.s32.totalorder %s1842_s27, %s1842_s27 }
  0x72   :  { %p1849_p4 = por %p1848_p3, %p1847_p2 }
  0x74   :  { %p1850_p5 = pnand %p1849_p4, %p1843_p1 }
  0x76   :  { %1853 = shalt.err (!%p1850_p5)
}
  0x77   :  { %170 = dma.hbm_to_vmem [thread:$0]  %s2665_s12, 2048, %s2335_s21, [#allocation24], %s2168_s0, %s2168_s0, %s2169_s22  }
  0x78   :  { %s2170_s29 = smov [#allocation26]   ;;  %s2171_s1 = smov [#allocation29]  }
  0x79   :  { %s186_s20 = sshll.u32 %s2170_s29, 4  ;;  %s208_s8 = sshll.u32 %s2171_s1, 4  ;;  %s187_s20 = int_to_ptr.vmem [resolvable:$true] %s186_s20  ;;  %s2372_s8 = int_to_ptr.vmem [resolvable:$true] %s208_s8 }
  0x7a   :  { %s1854_s6 = scalar_lea.hbm %s2667_s14, 2048 }
  0x7b   :  { %p1855_p6 = scmp.ne.s32.totalorder %s2667_s14, %s1854_s6  ;;  %p1858_p7 = scmp.lt.u32.totalorder %s1854_s6, %s2667_s14 }
  0x7d   :  { %p1860_p8 = pnand %p1858_p7, %p1855_p6 }
  0x7f   :  { %1863 = shalt.err (!%p1860_p8)
}
  0x80   :  { %s1864_s12 = scalar_lea.vmem %s187_s20, 2048  ;;  %p1869_p10 = scmp.lt.s32.totalorder %s187_s20, %s187_s20 }
  0x81   :  { %p1865_p9 = scmp.ne.s32.totalorder %s187_s20, %s1864_s12  ;;  %p1870_p11 = scmp.lt.s32.totalorder %s1864_s12, %s1864_s12 }
  0x83   :  { %p1871_p12 = por %p1870_p11, %p1869_p10 }
  0x85   :  { %p1872_p13 = pnand %p1871_p12, %p1865_p9 }
  0x87   :  { %1875 = shalt.err (!%p1872_p13)
}
  0x88   :  { %192 = dma.hbm_to_vmem [thread:$0]  %s2667_s14, 2048, %s187_s20, [#allocation27], %s2168_s0, %s2168_s0, %s2169_s22  }
  0x89   :  { %s1876_s10 = scalar_lea.hbm %s2669_s16, 2048 }
  0x8a   :  { %p1877_p0 = scmp.ne.s32.totalorder %s2669_s16, %s1876_s10  ;;  %p1880_p1 = scmp.lt.u32.totalorder %s1876_s10, %s2669_s16 }
  0x8c   :  { %p1882_p2 = pnand %p1880_p1, %p1877_p0 }
  0x8e   :  { %1885 = shalt.err (!%p1882_p2)
}
  0x8f   :  { %s1886_s23 = scalar_lea.vmem %s2372_s8, 2048  ;;  %p1891_p4 = scmp.lt.s32.totalorder %s2372_s8, %s2372_s8 }
  0x90   :  { %p1887_p3 = scmp.ne.s32.totalorder %s2372_s8, %s1886_s23  ;;  %p1892_p5 = scmp.lt.s32.totalorder %s1886_s23, %s1886_s23 }
  0x92   :  { %p1893_p6 = por %p1892_p5, %p1891_p4 }
  0x94   :  { %p1894_p7 = pnand %p1893_p6, %p1887_p3 }
  0x96   :  { %1897 = shalt.err (!%p1894_p7)
}
  0x97   :  { %214 = dma.hbm_to_vmem [thread:$0]  %s2669_s16, 2048, %s2372_s8, [#allocation30], %s2168_s0, %s2168_s0, %s2169_s22  }
  0x98   :  { %s2172_s6 = smov [#allocation5]   ;;  %s2173_s25 = smov [#allocation10]  }
  0x99   :  { %s44_s28 = sshll.u32 %s2172_s6, 4  ;;  %s66_s4 = sshll.u32 %s2173_s25, 4  ;;  %s45_s28 = int_to_ptr.vmem [resolvable:$true] %s44_s28  ;;  %s2409_s4 = int_to_ptr.vmem [resolvable:$true] %s66_s4 }
  0x9a   :  { %s2681_s21 = sld [smem:[#allocation47_spill]] }
  0xa0   :  { %s1898_s30 = scalar_lea.hbm %s2681_s21, 256 }
  0xa1   :  { %p1899_p8 = scmp.ne.s32.totalorder %s2681_s21, %s1898_s30  ;;  %p1902_p9 = scmp.lt.u32.totalorder %s1898_s30, %s2681_s21 }
  0xa3   :  { %p1904_p10 = pnand %p1902_p9, %p1899_p8 }
  0xa5   :  { %1907 = shalt.err (!%p1904_p10)
}
  0xa6   :  { %s1908_s16 = scalar_lea.vmem %s45_s28, 256  ;;  %p1913_p12 = scmp.lt.s32.totalorder %s45_s28, %s45_s28 }
  0xa7   :  { %p1909_p11 = scmp.ne.s32.totalorder %s45_s28, %s1908_s16  ;;  %p1914_p13 = scmp.lt.s32.totalorder %s1908_s16, %s1908_s16 }
  0xa9   :  { %p1915_p0 = por %p1914_p13, %p1913_p12 }
  0xab   :  { %p1916_p1 = pnand %p1915_p0, %p1909_p11 }
  0xad   :  { %1919 = shalt.err (!%p1916_p1)
}
  0xae   :  { %50 = dma.hbm_to_vmem [thread:$0]  %s2681_s21, 256, %s45_s28, [#allocation6], %s2168_s0, %s2168_s0, %s2169_s22  }
  0xaf   :  { %s2682_s23 = sld [smem:[#allocation49_spill]] }
  0xb5   :  { %s1920_s14 = scalar_lea.hbm %s2682_s23, 256 }
  0xb6   :  { %p1921_p2 = scmp.ne.s32.totalorder %s2682_s23, %s1920_s14  ;;  %p1924_p3 = scmp.lt.u32.totalorder %s1920_s14, %s2682_s23 }
  0xb8   :  { %p1926_p4 = pnand %p1924_p3, %p1921_p2 }
  0xba   :  { %1929 = shalt.err (!%p1926_p4)
}
  0xbb   :  { %s1930_s12 = scalar_lea.vmem %s2409_s4, 256  ;;  %p1935_p6 = scmp.lt.s32.totalorder %s2409_s4, %s2409_s4 }
  0xbc   :  { %p1931_p5 = scmp.ne.s32.totalorder %s2409_s4, %s1930_s12  ;;  %p1936_p7 = scmp.lt.s32.totalorder %s1930_s12, %s1930_s12 }
  0xbe   :  { %p1937_p8 = por %p1936_p7, %p1935_p6 }
  0xc0   :  { %p1938_p9 = pnand %p1937_p8, %p1931_p5 }
  0xc2   :  { %1941 = shalt.err (!%p1938_p9)
}
  0xc3   :  { %72 = dma.hbm_to_vmem [thread:$0]  %s2682_s23, 256, %s2409_s4, [#allocation9], %s2168_s0, %s2168_s0, %s2169_s22  }
  0xc4   :  { %s2174_s30 = smov [#allocation13]   ;;  %s2175_s27 = smov [#allocation16]  }
  0xc5   :  { %s88_s2 = sshll.u32 %s2174_s30, 4  ;;  %s110_s10 = sshll.u32 %s2175_s27, 4  ;;  %s89_s2 = int_to_ptr.vmem [resolvable:$true] %s88_s2  ;;  %s2446_s10 = int_to_ptr.vmem [resolvable:$true] %s110_s10 }
  0xc6   :  { %s1942_s8 = scalar_lea.hbm %s2658_s5, 384 }
  0xc7   :  { %p1943_p10 = scmp.ne.s32.totalorder %s2658_s5, %s1942_s8  ;;  %p1946_p11 = scmp.lt.u32.totalorder %s1942_s8, %s2658_s5 }
  0xc9   :  { %p1948_p12 = pnand %p1946_p11, %p1943_p10 }
  0xcb   :  { %1951 = shalt.err (!%p1948_p12)
}
  0xcc   :  { %s1952_s4 = scalar_lea.vmem %s89_s2, 384  ;;  %p1957_p0 = scmp.lt.s32.totalorder %s89_s2, %s89_s2 }
  0xcd   :  { %p1953_p13 = scmp.ne.s32.totalorder %s89_s2, %s1952_s4  ;;  %p1958_p1 = scmp.lt.s32.totalorder %s1952_s4, %s1952_s4 }
  0xcf   :  { %p1959_p2 = por %p1958_p1, %p1957_p0 }
  0xd1   :  { %p1960_p3 = pnand %p1959_p2, %p1953_p13 }
  0xd3   :  { %1963 = shalt.err (!%p1960_p3)
}
  0xd4   :  { %94 = dma.hbm_to_vmem [thread:$0]  %s2658_s5, 384, %s89_s2, [#allocation12], %s2168_s0, %s2168_s0, %s2169_s22  }
  0xd5   :  { %s1964_s26 = scalar_lea.hbm %s2660_s7, 384 }
  0xd6   :  { %p1965_p4 = scmp.ne.s32.totalorder %s2660_s7, %s1964_s26  ;;  %p1968_p5 = scmp.lt.u32.totalorder %s1964_s26, %s2660_s7 }
  0xd8   :  { %p1970_p6 = pnand %p1968_p5, %p1965_p4 }
  0xda   :  { %1973 = shalt.err (!%p1970_p6)
}
  0xdb   :  { %s1974_s27 = scalar_lea.vmem %s2446_s10, 384  ;;  %p1979_p8 = scmp.lt.s32.totalorder %s2446_s10, %s2446_s10 }
  0xdc   :  { %p1975_p7 = scmp.ne.s32.totalorder %s2446_s10, %s1974_s27  ;;  %p1980_p9 = scmp.lt.s32.totalorder %s1974_s27, %s1974_s27 }
  0xde   :  { %p1981_p10 = por %p1980_p9, %p1979_p8 }
  0xe0   :  { %p1982_p11 = pnand %p1981_p10, %p1975_p7 }
  0xe2   :  { %1985 = shalt.err (!%p1982_p11)
}
  0xe3   :  { %116 = dma.hbm_to_vmem [thread:$0]  %s2660_s7, 384, %s2446_s10, [#allocation15], %s2168_s0, %s2168_s0, %s2169_s22  }
  0xe4   :  { %s2176_s3 = smov [#allocation19]   ;;  %s2177_s8 = smov [#allocation22]  }
  0xe5   :  { %s133_s16 = sshll.u32 %s2176_s3, 4  ;;  %s155_s29 = sshll.u32 %s2177_s8, 4  ;;  %s134_s16 = int_to_ptr.vmem [resolvable:$true] %s133_s16  ;;  %s156_s29 = int_to_ptr.vmem [resolvable:$true] %s155_s29 }
  0xe6   :  { %s1986_s14 = scalar_lea.hbm %s2662_s9, 16 }
  0xe7   :  { %p1987_p12 = scmp.ne.s32.totalorder %s2662_s9, %s1986_s14  ;;  %p1990_p13 = scmp.lt.u32.totalorder %s1986_s14, %s2662_s9 }
  0xe9   :  { %p1992_p0 = pnand %p1990_p13, %p1987_p12 }
  0xeb   :  { %1995 = shalt.err (!%p1992_p0)
}
  0xec   :  { %s1996_s7 = scalar_lea.vmem %s134_s16, 16  ;;  %s2000_s10 = scalar_lea.vmem %s134_s16, 32 }
  0xed   :  { %p1997_p1 = scmp.ne.s32.totalorder %s134_s16, %s1996_s7  ;;  %p2001_p2 = scmp.lt.s32.totalorder %s134_s16, %s134_s16 }
  0xee   :  { %p2002_p3 = scmp.lt.s32.totalorder %s2000_s10, %s1996_s7 }
  0xf0   :  { %p2003_p4 = por %p2002_p3, %p2001_p2 }
  0xf2   :  { %p2004_p5 = pnand %p2003_p4, %p1997_p1 }
  0xf4   :  { %2007 = shalt.err (!%p2004_p5)
}
  0xf5   :  { %136 = dma.hbm_to_vmem [thread:$0]  %s2662_s9, 16, %s134_s16, [#allocation18]  }
  0xf6   :  { %s2008_s21 = scalar_lea.hbm %s2664_s11, 16 }
  0xf7   :  { %p2009_p6 = scmp.ne.s32.totalorder %s2664_s11, %s2008_s21  ;;  %p2012_p7 = scmp.lt.u32.totalorder %s2008_s21, %s2664_s11 }
  0xf9   :  { %p2014_p8 = pnand %p2012_p7, %p2009_p6 }
  0xfb   :  { %2017 = shalt.err (!%p2014_p8)
}
  0xfc   :  { %s2018_s3 = scalar_lea.vmem %s156_s29, 16  ;;  %s2022_s8 = scalar_lea.vmem %s156_s29, 32 }
  0xfd   :  { %p2019_p9 = scmp.ne.s32.totalorder %s156_s29, %s2018_s3  ;;  %p2023_p10 = scmp.lt.s32.totalorder %s156_s29, %s156_s29 }
  0xfe   :  { %p2024_p11 = scmp.lt.s32.totalorder %s2022_s8, %s2018_s3 }
 0x100   :  { %p2025_p12 = por %p2024_p11, %p2023_p10 }
 0x102   :  { %p2026_p13 = pnand %p2025_p12, %p2019_p9 }
 0x104   :  { %2029 = shalt.err (!%p2026_p13)
}
 0x105   :  { %158 = dma.hbm_to_vmem [thread:$0]  %s2664_s11, 16, %s156_s29, [#allocation21]  }
 0x106   :  { %s2178_s1 = smov [#allocation25]   ;;  %s2179_s14 = smov [#allocation28]  }
 0x107   :  { %s177_s24 = sshll.u32 %s2178_s1, 4  ;;  %s199_s4 = sshll.u32 %s2179_s14, 4  ;;  %s178_s24 = int_to_ptr.vmem [resolvable:$true] %s177_s24  ;;  %s200_s4 = int_to_ptr.vmem [resolvable:$true] %s199_s4 }
 0x108   :  { %s2030_s6 = scalar_lea.hbm %s2666_s13, 16 }
 0x109   :  { %p2031_p0 = scmp.ne.s32.totalorder %s2666_s13, %s2030_s6  ;;  %p2034_p1 = scmp.lt.u32.totalorder %s2030_s6, %s2666_s13 }
 0x10b   :  { %p2036_p2 = pnand %p2034_p1, %p2031_p0 }
 0x10d   :  { %2039 = shalt.err (!%p2036_p2)
}
 0x10e   :  { %s2040_s11 = scalar_lea.vmem %s178_s24, 16  ;;  %s2044_s29 = scalar_lea.vmem %s178_s24, 32 }
 0x10f   :  { %p2041_p3 = scmp.ne.s32.totalorder %s178_s24, %s2040_s11  ;;  %p2045_p4 = scmp.lt.s32.totalorder %s178_s24, %s178_s24 }
 0x110   :  { %p2046_p5 = scmp.lt.s32.totalorder %s2044_s29, %s2040_s11 }
 0x112   :  { %p2047_p6 = por %p2046_p5, %p2045_p4 }
 0x114   :  { %p2048_p7 = pnand %p2047_p6, %p2041_p3 }
 0x116   :  { %2051 = shalt.err (!%p2048_p7)
}
 0x117   :  { %180 = dma.hbm_to_vmem [thread:$0]  %s2666_s13, 16, %s178_s24, [#allocation24]  }
 0x118   :  { %s2052_s27 = scalar_lea.hbm %s2668_s15, 16 }
 0x119   :  { %p2053_p8 = scmp.ne.s32.totalorder %s2668_s15, %s2052_s27  ;;  %p2056_p9 = scmp.lt.u32.totalorder %s2052_s27, %s2668_s15 }
 0x11b   :  { %p2058_p10 = pnand %p2056_p9, %p2053_p8 }
 0x11d   :  { %2061 = shalt.err (!%p2058_p10)
}
 0x11e   :  { %s2062_s9 = scalar_lea.vmem %s200_s4, 16  ;;  %s2066_s16 = scalar_lea.vmem %s200_s4, 32 }
 0x11f   :  { %p2063_p11 = scmp.ne.s32.totalorder %s200_s4, %s2062_s9  ;;  %p2067_p12 = scmp.lt.s32.totalorder %s200_s4, %s200_s4 }
 0x120   :  { %p2068_p13 = scmp.lt.s32.totalorder %s2066_s16, %s2062_s9 }
 0x122   :  { %p2069_p0 = por %p2068_p13, %p2067_p12 }
 0x124   :  { %p2070_p1 = pnand %p2069_p0, %p2063_p11 }
 0x126   :  { %2073 = shalt.err (!%p2070_p1)
}
 0x127   :  { %202 = dma.hbm_to_vmem [thread:$0]  %s2668_s15, 16, %s200_s4, [#allocation27]  }
 0x128   :  { %s2180_s24 = smov [#allocation31]   ;;  %s2074_s6 = scalar_lea.hbm %s2670_s17, 16 }
 0x129   :  { %s221_s14 = sshll.u32 %s2180_s24, 4  ;;  %p2075_p2 = scmp.ne.s32.totalorder %s2670_s17, %s2074_s6  ;;  %s222_s14 = int_to_ptr.vmem [resolvable:$true] %s221_s14 }
 0x12a   :  { %p2078_p3 = scmp.lt.u32.totalorder %s2074_s6, %s2670_s17 }
 0x12c   :  { %p2080_p4 = pnand %p2078_p3, %p2075_p2 }
 0x12e   :  { %2083 = shalt.err (!%p2080_p4)
}
 0x12f   :  { %s2084_s11 = scalar_lea.vmem %s222_s14, 16  ;;  %s2088_s15 = scalar_lea.vmem %s222_s14, 32 }
 0x130   :  { %p2085_p5 = scmp.ne.s32.totalorder %s222_s14, %s2084_s11  ;;  %p2089_p6 = scmp.lt.s32.totalorder %s222_s14, %s222_s14 }
 0x131   :  { %p2090_p7 = scmp.lt.s32.totalorder %s2088_s15, %s2084_s11 }
 0x133   :  { %p2091_p8 = por %p2090_p7, %p2089_p6 }
 0x135   :  { %p2092_p9 = pnand %p2091_p8, %p2085_p5 }
 0x137   :  { %2095 = shalt.err (!%p2092_p9)
}
 0x138   :  { %224 = dma.hbm_to_vmem [thread:$0]  %s2670_s17, 16, %s222_s14, [#allocation30]  }
 0x139   :  { %2140 = dma.done.wait [#allocation6], 256  }
 0x13a   :  { %2141 = vsyncadd [#allocation6], 4294967040 }
 0x13b   :  { %2142 = dma.done.wait [#allocation9], 384  }
 0x13c   :  { %2143 = vsyncadd [#allocation9], 4294966912 }
 0x13d   :  { %2144 = dma.done.wait [#allocation12], 400  }
 0x13e   :  { %2145 = vsyncadd [#allocation12], 4294966896 }
 0x13f   :  { %2146 = dma.done.wait [#allocation15], 400  }
 0x140   :  { %2147 = vsyncadd [#allocation15], 4294966896 }
 0x141   :  { %2148 = dma.done.wait [#allocation18], 144  }
 0x142   :  { %2149 = vsyncadd [#allocation18], 4294967152 }
 0x143   :  { %2150 = dma.done.wait [#allocation21], 2064  }
 0x144   :  { %2151 = vsyncadd [#allocation21], 4294965232 }
 0x145   :  { %2152 = dma.done.wait [#allocation24], 2064  }
 0x146   :  { %2153 = vsyncadd [#allocation24], 4294965232 }
 0x147   :  { %2154 = dma.done.wait [#allocation27], 2064  }
 0x148   :  { %2155 = vsyncadd [#allocation27], 4294965232 }
 0x149   :  { %2156 = dma.done.wait [#allocation30], 2064  }
 0x14a   :  { %2157 = vsyncadd [#allocation30], 4294965232  ;;  %v2181_v0 = vmov 0   ;;  %v282_v1 = vld [vmem:[#allocation10] sm:$0xff]  ;;  %v283_v2 = vld [vmem:[#allocation10 + $0x8] sm:$0xff]  ;;  %v2182_v3 = vmov 0.0   ;;  %v280_v13 = vlaneseq }
 0x14b   :  { %1715 = vset.pattern.permute.xlu0 %v2181_v0  ;;  %1716 = vset.pattern.permute.xlu1 %v2181_v0  ;;  %v2544_v4 = vld [vmem:[#allocation8] sm:$0xff]  ;;  %v494_v5 = vld [vmem:[#allocation13 + $0x10] sm:$0xff]  ;;  %vm924_vm0 = vcmp.ge.s32.totalorder %v282_v1, 0  ;;  %vm925_vm1 = vcmp.ge.s32.totalorder %v283_v2, 0  ;;  %v389_v8 = vld [vmem:[#allocation16] sm:$0xff]  ;;  %vm299_vm2 = vcmask 64512  }
 0x14c   :  { %285 = vperm.xlu0 %1715, %v282_v1   ;;  %1379 = vmatprep.subr.mxu1 %v2182_v3  ;;  %v492_v6 = vld [vmem:[#allocation13] sm:$0xff]  ;;  %v392_v7 = vld [vmem:[#allocation17] sm:$0xff]  ;;  %v493_v9 = vld [vmem:[#allocation13 + $0x8] sm:$0xff]  ;;  %v1277_v10 = vsel %vm924_vm0, 1.0, %v2182_v3  ;;  %v1278_v11 = vsel %vm925_vm1, 1.0, %v2182_v3  ;;  %vm2183_vm3 = vmmov 0  }
 0x14d   :  { %1374 = vmatprep.subr.mxu0 %v2544_v4  ;;  %496 = vperm.xlu1 %1716, %v492_v6   ;;  %v1717_v12 = vpack.i.bf16 %v1278_v11, %v1277_v10  ;;  %v281_v14 = vand.u32 127, %v280_v13  ;;  %v390_v19 = vld [vmem:[#allocation16 + $0x8] sm:$0xff]  ;;  %v391_v20 = vld [vmem:[#allocation16 + $0x10] sm:$0xff]  ;;  %v2184_v21 = vmov 0.0|0.0   ;;  %v296_v23 = vld [vmem:[#allocation5] sm:$0xff]  ;;  %vm513_vm7 = vcmask 130048  }
 0x14e   :  { %1375 = vmatpush3.msra.mxu0 %v2544_v4  ;;  %1380 = vmatpush3.msra.mxu1 %v392_v7  ;;  %v297_v22 = vld [vmem:[#allocation5 + $0x8] sm:$0xff]  ;;  %v2585_v35 = vshrl.u32 %v280_v13, 7  ;;  %v1270_v36 = vld [vmem:[#allocation14] ss:$0 sm:$0xff]  ;;  %vm622_vm11 = vcmask 195584   ;;  %v724_v55 = vld [vmem:[#allocation20 + $0x10] sm:$0xff] }
 0x14f   :  { %1381 = vmatprep.mubr.msk.f32.mxu1 %vm2183_vm3, %v2182_v3  ;;  %1559 = vmatprep.subr.bf16.mxu1 %v2184_v21  ;;  %v1260_v38 = vld [vmem:[#allocation19] ss:$0 sm:$0xff]  ;;  %v722_v52 = vld [vmem:[#allocation20] sm:$0xff]  ;;  %v723_v53 = vld [vmem:[#allocation20 + $0x8] sm:$0xff]  ;;  %s2683_s28 = sld [smem:[#allocation46_spill]]  ;;  %s2185_s30 = smov [#allocation32]  }
 0x150   :  { %288 = vperm.xlu0 %1715, %v283_v2   ;;  %1382 = vmatmul.mubr.msk.f32.vlgmr.msra.gmra.mrb[0].mxu1 %vm299_vm2, %v389_v8  ;;  %vm614_vm10 = vcmp.eq.s32.totalorder %v2585_v35, %v1270_v36  ;;  %v608_v47 = vadd.s32 8, %v2585_v35  ;;  %v725_v56 = vld [vmem:[#allocation20 + $0x18] sm:$0xff]  ;;  %v1566_v57 = vpack.c.bf16 %v723_v53, %v722_v52  ;;  %v726_v60 = vld [vmem:[#allocation20 + $0x20] sm:$0xff]  ;;  %v727_v61 = vld [vmem:[#allocation20 + $0x28] sm:$0xff]  ;;  %s1222_s27 = sshll.u32 %s2185_s30, 4  ;;  %s1223_s27 = int_to_ptr.vmem [resolvable:$true] %s1222_s27 }
 0x151   :  { %1384 = vmatprep.mubr.msk.f32.mxu1 %vm2183_vm3, %v2182_v3  ;;  %499 = vperm.xlu1 %1716, %v493_v9   ;;  %v1271_v37 = vsel %vm614_vm10, 1.0, %v2182_v3  ;;  %v1570_v59 = vpack.c.bf16 %v725_v56, %v724_v55  ;;  %v1574_v62 = vpack.c.bf16 %v727_v61, %v726_v60  ;;  %v728_v63 = vld [vmem:[#allocation20 + $0x30] sm:$0xff]  ;;  %v729_v0 = vld [vmem:[#allocation20 + $0x38] sm:$0xff]  ;;  %v730_v2 = vld [vmem:[#allocation20 + $0x40] sm:$0xff]  ;;  %s2096_s5 = scalar_lea.vmem %s1223_s27, 256  ;;  %p2101_p11 = scmp.lt.s32.totalorder %s1223_s27, %s1223_s27 }
 0x152   :  { %vm615_vm12 = vcmp.eq.s32.totalorder %v608_v47, %v1270_v36  ;;  %v1578_v1 = vpack.c.bf16 %v729_v0, %v728_v63  ;;  %v732_v7 = vld [vmem:[#allocation20 + $0x50] sm:$0xff]  ;;  %v733_v8 = vld [vmem:[#allocation20 + $0x58] sm:$0xff]  ;;  %v734_v10 = vld [vmem:[#allocation20 + $0x60] sm:$0xff]  ;;  %p2097_p10 = scmp.ne.s32.totalorder %s1223_s27, %s2096_s5  ;;  %p2102_p12 = scmp.lt.s32.totalorder %s2096_s5, %s2096_s5 }
 0x153   :  { %v1272_v58 = vsel %vm615_vm12, 1.0, %v2182_v3  ;;  %v1586_v9 = vpack.c.bf16 %v733_v8, %v732_v7  ;;  %v735_v11 = vld [vmem:[#allocation20 + $0x68] sm:$0xff]  ;;  %v736_v13 = vld [vmem:[#allocation20 + $0x70] sm:$0xff]  ;;  %v1031_v53 = vld [vmem:[#allocation26 + $0x18] sm:$0xff] }
 0x154   :  { %502 = vperm.xlu0 %1715, %v494_v5   ;;  %1385 = vmatmul.mubr.msk.f32.gmra.mrb[2].mxu1 %vm299_vm2, %v390_v19  ;;  %v731_v5 = vld [vmem:[#allocation20 + $0x48] sm:$0xff]  ;;  %v832_v36 = vld [vmem:[#allocation23 + $0x50] sm:$0xff]  ;;  %v1039_v63 = vld [vmem:[#allocation26 + $0x58] sm:$0xff]  ;;  %p2103_p13 = por %p2102_p12, %p2101_p11 }
 0x155   :  { %1718 = vperm.xlu1 %1716, %v1717_v12   ;;  %1387 = vmatprep.mubr.msk.f32.mxu1 %vm2183_vm3, %v2182_v3  ;;  %v1582_v6 = vpack.c.bf16 %v731_v5, %v730_v2  ;;  %v1590_v12 = vpack.c.bf16 %v735_v11, %v734_v10  ;;  %s712_s21 = sadd.f32 1.0, %s2683_s28  ;;  %v1034_v56 = vld [vmem:[#allocation26 + $0x30] sm:$0xff]  ;;  %v1037_v60 = vld [vmem:[#allocation26 + $0x48] sm:$0xff]  ;;  %v1043_v10 = vld [vmem:[#allocation26 + $0x78] sm:$0xff] }
 0x156   :  { %v1041_v2 = vld [vmem:[#allocation26 + $0x68] sm:$0xff]  ;;  %v837_v7 = vld [vmem:[#allocation23 + $0x78] sm:$0xff]  ;;  %p2104_p0 = pnand %p2103_p13, %p2097_p10 }
 0x158   :  { %1388 = vmatmul.mubr.msk.f32.gmra.mrb[4].mxu1 %vm299_vm2, %v391_v20  ;;  %v825_v20 = vld [vmem:[#allocation23 + $0x18] sm:$0xff] }
 0x159   :  { %1394 = vmatprep.mubr.msk.f32.mxu1 %vm2183_vm3, %v2182_v3 }
 0x1cb   :  { %v286_v15 = vpop.permute.xlu0 %285 }
 0x1cc   :  { %vm290_vm4 = vcmp.eq.s32.totalorder %v281_v14, %v286_v15  ;;  %v497_v28 = vpop.permute.xlu1 %496 }
 0x1cd   :  { %v1256_v16 = vsel %vm290_vm4, 1.0, %v2182_v3  ;;  %vm504_vm6 = vcmp.eq.s32.totalorder %v281_v14, %v497_v28  ;;  %v828_v28 = vld [vmem:[#allocation23 + $0x30] sm:$0xff] }
 0x1ce   :  { %1376 = vmatprep.mubr.msk.f32.mxu0 %vm299_vm2, %v1256_v16  ;;  %v1264_v30 = vsel %vm504_vm6, 1.0, %v2182_v3  ;;  %v822_v16 = vld [vmem:[#allocation23] sm:$0xff] }
 0x1cf   :  { %v289_v17 = vpop.permute.xlu0 %288 }
 0x1d0   :  { %vm291_vm5 = vcmp.eq.s32.totalorder %v281_v14, %v289_v17  ;;  %v500_v31 = vpop.permute.xlu1 %499  ;;  %v823_v17 = vld [vmem:[#allocation23 + $0x8] sm:$0xff] }
 0x1d1   :  { %v1257_v18 = vsel %vm291_vm5, 1.0, %v2182_v3  ;;  %vm505_vm8 = vcmp.eq.s32.totalorder %v281_v14, %v500_v31  ;;  %v1598_v19 = vpack.c.bf16 %v823_v17, %v822_v16  ;;  %v1122_v16 = vld [vmem:[#allocation29] sm:$0xff]  ;;  %v1123_v17 = vld [vmem:[#allocation29 + $0x8] sm:$0xff] }
 0x1d2   :  { %1377 = vmatmul.mubr.msk.f32.vlgmr.msra.gmra.mrb[0].mxu0 %vm299_vm2, %v1257_v18  ;;  %v1265_v33 = vsel %vm505_vm8, 1.0, %v2182_v3  ;;  %v824_v18 = vld [vmem:[#allocation23 + $0x10] sm:$0xff] }
 0x1d3   :  { %v503_v32 = vpop.permute.xlu0 %502  ;;  %1409 = vmatprep.mubr.msk.f32.mxu0 %vm622_vm11, %v1271_v37  ;;  %v833_v37 = vld [vmem:[#allocation23 + $0x58] sm:$0xff] }
 0x1d4   :  { %vm506_vm9 = vcmp.eq.s32.totalorder %v281_v14, %v503_v32  ;;  %v737_v14 = vld [vmem:[#allocation20 + $0x78] sm:$0xff]  ;;  %v830_v32 = vld [vmem:[#allocation23 + $0x40] sm:$0xff] }
 0x1d5   :  { %v1266_v34 = vsel %vm506_vm9, 1.0, %v2182_v3  ;;  %v1594_v15 = vpack.c.bf16 %v737_v14, %v736_v13 }
 0x2a5   :  { %v1378_v24 = vpop.f32.mrb[0].mxu0 }
 0x2a6   :  { %v2566_v25 = vadd.f32 %v1378_v24, %v297_v22  ;;  %v372_v26 = vpop.f32.mrb[1].mxu0  ;;  %v1602_v22 = vpack.c.bf16 %v825_v20, %v824_v18  ;;  %v827_v24 = vld [vmem:[#allocation23 + $0x28] sm:$0xff] }
 0x2a7   :  { %v2568_v27 = vadd.f32 %v372_v26, %v296_v23  ;;  %v826_v23 = vld [vmem:[#allocation23 + $0x20] sm:$0xff] }
 0x2a8   :  { %v1606_v26 = vpack.c.bf16 %v827_v24, %v826_v23 }
 0x2a9   :  { %v2572_v29 = vpack.c.bf16 %v2566_v25, %v2568_v27 }
 0x2ab   :  { %1561 = vmatpush3.bf16.msra.mxu1 %v2572_v29 }
 0x2ac   :  { %1599 = vmatprep.subr.bf16.mxu1 %v1598_v19 }
 0x2ae   :  { %1395 = vmatmul.mubr.msk.f32.vlgmr.msra.gmra.mrb[0].mxu1 %vm513_vm7, %v1264_v30  ;;  %v829_v30 = vld [vmem:[#allocation23 + $0x38] sm:$0xff] }
 0x2af   :  { %1397 = vmatprep.mubr.msk.f32.mxu1 %vm2183_vm3, %v2182_v3  ;;  %1601 = vmatpush3.bf16.msra.mxu1 %v1598_v19  ;;  %v1610_v31 = vpack.c.bf16 %v829_v30, %v828_v28  ;;  %v1124_v28 = vld [vmem:[#allocation29 + $0x10] sm:$0xff]  ;;  %v1125_v30 = vld [vmem:[#allocation29 + $0x18] sm:$0xff] }
 0x2b0   :  { %1603 = vmatprep.subr.bf16.mxu1 %v1602_v22 }
 0x2b2   :  { %1398 = vmatmul.mubr.msk.f32.gmra.mrb[2].mxu1 %vm513_vm7, %v1265_v33  ;;  %v831_v33 = vld [vmem:[#allocation23 + $0x48] sm:$0xff] }
 0x2b3   :  { %1400 = vmatprep.mubr.msk.f32.mxu1 %vm2183_vm3, %v2182_v3  ;;  %1605 = vmatpush3.bf16.msra.mxu1 %v1602_v22  ;;  %v1658_v22 = vpack.c.bf16 %v1123_v17, %v1122_v16 }
 0x2b4   :  { %1607 = vmatprep.subr.bf16.mxu1 %v1606_v26 }
 0x2b6   :  { %1401 = vmatmul.mubr.msk.f32.gmra.mrb[4].mxu1 %vm513_vm7, %v1266_v34  ;;  %v1614_v34 = vpack.c.bf16 %v831_v33, %v830_v32  ;;  %v1126_v32 = vld [vmem:[#allocation29 + $0x20] sm:$0xff]  ;;  %v1127_v33 = vld [vmem:[#allocation29 + $0x28] sm:$0xff] }
 0x2b7   :  { %1609 = vmatpush3.bf16.msra.mxu1 %v1606_v26 }
 0x2b8   :  { %1611 = vmatprep.subr.bf16.mxu1 %v1610_v31 }
 0x2bb   :  { %1613 = vmatpush3.bf16.msra.mxu1 %v1610_v31  ;;  %v1661_v31 = vpack.c.bf16 %v1125_v30, %v1124_v28 }
 0x2bc   :  { %1615 = vmatprep.subr.bf16.mxu1 %v1614_v34 }
 0x2bf   :  { %1617 = vmatpush3.bf16.msra.mxu1 %v1614_v34  ;;  %v1664_v34 = vpack.c.bf16 %v1127_v33, %v1126_v32 }
 0x381   :  { %v589_v39 = vpop.f32.mrb[0].mxu1 }
 0x382   :  { %v1396_v40 = vpop.f32.mrb[1].mxu1  ;;  %v1681_v41 = vadd.f32 %v1260_v38, %v589_v39  ;;  %v834_v39 = vld [vmem:[#allocation23 + $0x60] sm:$0xff] }
 0x383   :  { %v835_v40 = vld [vmem:[#allocation23 + $0x68] sm:$0xff] }
 0x384   :  { %v603_v45 = vmax.f32 %v1681_v41, 0.0  ;;  %v1622_v41 = vpack.c.bf16 %v835_v40, %v834_v39  ;;  %v1131_v39 = vld [vmem:[#allocation29 + $0x48] sm:$0xff] }
 0x385   :  { %v594_v42 = vpop.f32.mrb[2].mxu1 }
 0x386   :  { %v1682_v43 = vadd.f32 %v1260_v38, %v594_v42  ;;  %v1399_v44 = vpop.f32.mrb[3].mxu1  ;;  %v715_v42 = vstv %s712_s21 }
 0x388   :  { %v604_v46 = vmax.f32 %v1682_v43, 0.0  ;;  %v717_v43 = vmul.f32 %v715_v42, %v2566_v25 }
 0x389   :  { %v599_v48 = vpop.f32.mrb[4].mxu1 }
 0x38a   :  { %v1562_v49 = vpack.c.bf16 %v604_v46, %v603_v45  ;;  %v1683_v50 = vadd.f32 %v1260_v38, %v599_v48  ;;  %v1402_v51 = vpop.f32.mrb[5].mxu1  ;;  %v1618_v38 = vpack.c.bf16 %v833_v37, %v832_v36  ;;  %v716_v45 = vmul.f32 %v715_v42, %v2568_v27  ;;  %v1279_v46 = vld [vmem:[#allocation11] ss:$0 sm:$0xff]  ;;  %v1030_v27 = vld [vmem:[#allocation26 + $0x10] sm:$0xff] }
 0x38b   :  { %vm949_vm13 = vcmp.eq.s32.totalorder %v2585_v35, %v1279_v46  ;;  %v1029_v51 = vld [vmem:[#allocation26 + $0x8] sm:$0xff]  ;;  %v1637_v35 = vpack.c.bf16 %v1031_v53, %v1030_v27  ;;  %v1129_v36 = vld [vmem:[#allocation29 + $0x38] sm:$0xff]  ;;  %v1136_v46 = vld [vmem:[#allocation29 + $0x70] sm:$0xff] }
 0x38c   :  { %v605_v54 = vmax.f32 %v1683_v50, 0.0  ;;  %1563 = vmatprep.subr.bf16.mxu0 %v1562_v49  ;;  %1619 = vmatprep.subr.bf16.mxu1 %v1618_v38  ;;  %v1028_v50 = vld [vmem:[#allocation26] sm:$0xff]  ;;  %v1280_v25 = vsel %vm949_vm13, 1.0, %v2182_v3 }
 0x38d   :  { %1565 = vmatpush3.bf16.msra.mxu0 %v1562_v49  ;;  %1621 = vmatpush3.bf16.msra.mxu1 %v1618_v38  ;;  %v1634_v52 = vpack.c.bf16 %v1029_v51, %v1028_v50  ;;  %v1130_v38 = vld [vmem:[#allocation29 + $0x40] sm:$0xff]  ;;  %v1282_v50 = vld [vmem:[#allocation28] ss:$0 sm:$0xff]  ;;  %v1719_v51 = vpop.permute.xlu1 %1718 }
 0x38e   :  { %1407 = vmatprep.subr.mxu0 %v605_v54  ;;  %1623 = vmatprep.subr.bf16.mxu1 %v1622_v41  ;;  %v1670_v40 = vpack.c.bf16 %v1131_v39, %v1130_v38 }
 0x391   :  { %1408 = vmatpush3.msra.mxu0 %v605_v54  ;;  %1625 = vmatpush3.bf16.msra.mxu1 %v1622_v41  ;;  %v1033_v54 = vld [vmem:[#allocation26 + $0x28] sm:$0xff]  ;;  %v1133_v41 = vld [vmem:[#allocation29 + $0x58] sm:$0xff] }
 0x392   :  { %1410 = vmatmul.mubr.msk.f32.vlgmr.msra.gmra.mrb[2].mxu0 %vm622_vm11, %v1272_v58  ;;  %1567 = vmatprep.subr.bf16.mxu0 %v1566_v57 }
 0x393   :  { %1569 = vmatpush3.bf16.msra.mxu0 %v1566_v57  ;;  %v1035_v57 = vld [vmem:[#allocation26 + $0x38] sm:$0xff] }
 0x394   :  { %1571 = vmatprep.subr.bf16.mxu0 %v1570_v59  ;;  %v1643_v58 = vpack.c.bf16 %v1035_v57, %v1034_v56 }
 0x397   :  { %1573 = vmatpush3.bf16.msra.mxu0 %v1570_v59  ;;  %v1036_v59 = vld [vmem:[#allocation26 + $0x40] sm:$0xff] }
 0x398   :  { %1575 = vmatprep.subr.bf16.mxu0 %v1574_v62  ;;  %v1646_v61 = vpack.c.bf16 %v1037_v60, %v1036_v59 }
 0x39b   :  { %1577 = vmatpush3.bf16.msra.mxu0 %v1574_v62  ;;  %v1038_v62 = vld [vmem:[#allocation26 + $0x50] sm:$0xff] }
 0x39c   :  { %1579 = vmatprep.subr.bf16.mxu0 %v1578_v1  ;;  %v1649_v0 = vpack.c.bf16 %v1039_v63, %v1038_v62 }
 0x39f   :  { %1581 = vmatpush3.bf16.msra.mxu0 %v1578_v1  ;;  %v1040_v1 = vld [vmem:[#allocation26 + $0x60] sm:$0xff] }
 0x3a0   :  { %1583 = vmatprep.subr.bf16.mxu0 %v1582_v6  ;;  %v1652_v5 = vpack.c.bf16 %v1041_v2, %v1040_v1 }
 0x3a3   :  { %1585 = vmatpush3.bf16.msra.mxu0 %v1582_v6  ;;  %v836_v6 = vld [vmem:[#allocation23 + $0x70] sm:$0xff] }
 0x3a4   :  { %1587 = vmatprep.subr.bf16.mxu0 %v1586_v9  ;;  %v1626_v8 = vpack.c.bf16 %v837_v7, %v836_v6 }
 0x3a6   :  { %1627 = vmatprep.subr.bf16.mxu1 %v1626_v8 }
 0x3a7   :  { %1589 = vmatpush3.bf16.msra.mxu0 %v1586_v9  ;;  %v1042_v9 = vld [vmem:[#allocation26 + $0x70] sm:$0xff]  ;;  %1629 = vmatpush3.bf16.msra.mxu1 %v1626_v8 }
 0x3a8   :  { %1591 = vmatprep.subr.bf16.mxu0 %v1590_v12  ;;  %v1655_v11 = vpack.c.bf16 %v1043_v10, %v1042_v9  ;;  %1657 = vmatprep.subr.bf16.mxu1 %v2184_v21 }
 0x3ab   :  { %1593 = vmatpush3.bf16.msra.mxu0 %v1590_v12  ;;  %v1275_v12 = vld [vmem:[#allocation22] ss:$0 sm:$0xff] }
 0x3ac   :  { %1595 = vmatprep.subr.bf16.mxu0 %v1594_v15 }
 0x3af   :  { %1597 = vmatpush3.bf16.msra.mxu0 %v1594_v15 }
 0x3b0   :  { %1630 = vmatprep.subr.bf16.mxu0 %v2184_v21 }
 0x465   :  { %v1411_v44 = vpop.f32.mrb[2].mxu0 }
 0x466   :  { %v721_v47 = vadd.f32 %v1411_v44, %v717_v43  ;;  %v695_v48 = vpop.f32.mrb[3].mxu0  ;;  %v1134_v43 = vld [vmem:[#allocation29 + $0x60] sm:$0xff]  ;;  %v1135_v44 = vld [vmem:[#allocation29 + $0x68] sm:$0xff] }
 0x467   :  { %v720_v49 = vadd.f32 %v716_v45, %v695_v48  ;;  %v1676_v45 = vpack.c.bf16 %v1135_v44, %v1134_v43 }
 0x469   :  { %1444 = vmatprep.mubr.f32.mxu0 %v720_v49  ;;  %v1276_v49 = vld [vmem:[#allocation25] ss:$0 sm:$0xff] }
 0x46a   :  { %1445 = vmatmul.mubr.f32.vlgmr.msra.gmra.mrb[4].mxu0 %v721_v47  ;;  %v1137_v47 = vld [vmem:[#allocation29 + $0x78] sm:$0xff] }
 0x46b   :  { %1632 = vmatpush3.bf16.msra.mxu0 %v2572_v29  ;;  %1486 = vmatprep.mubr.msk.f32.mxu0 %vm2183_vm3, %v2182_v3  ;;  %v1032_v29 = vld [vmem:[#allocation26 + $0x20] sm:$0xff]  ;;  %v1679_v48 = vpack.c.bf16 %v1137_v47, %v1136_v46 }
 0x46c   :  { %1633 = vmatprep.subr.bf16.mxu0 %v2184_v21  ;;  %v1640_v55 = vpack.c.bf16 %v1033_v54, %v1032_v29 }
 0x46e   :  { %1487 = vmatmul.mubr.msk.f32.vlgmr.msra.gmra.mrb[6].mxu0 %vm513_vm7, %v1280_v25 }
 0x46f   :  { %1635 = vmatpush3.bf16.msra.mxu0 %v1634_v52  ;;  %1521 = vmatprep.mubr.msk.f32.mxu0 %vm2183_vm3, %v2182_v3 }
 0x470   :  { %1636 = vmatprep.subr.bf16.mxu0 %v2184_v21 }
 0x473   :  { %1638 = vmatpush3.bf16.msra.mxu0 %v1637_v35 }
 0x474   :  { %1639 = vmatprep.subr.bf16.mxu0 %v2184_v21 }
 0x477   :  { %1641 = vmatpush3.bf16.msra.mxu0 %v1640_v55  ;;  %v1721_v55 = vunpack.i.h.bf16 %v1719_v51 }
 0x478   :  { %1642 = vmatprep.subr.bf16.mxu0 %v2184_v21 }
 0x47b   :  { %1644 = vmatpush3.bf16.msra.mxu0 %v1643_v58  ;;  %v1720_v58 = vunpack.i.l.bf16 %v1719_v51 }
 0x47c   :  { %1645 = vmatprep.subr.bf16.mxu0 %v2184_v21 }
 0x47f   :  { %1647 = vmatpush3.bf16.msra.mxu0 %v1646_v61 }
 0x480   :  { %1648 = vmatprep.subr.bf16.mxu0 %v2184_v21 }
 0x483   :  { %1650 = vmatpush3.bf16.msra.mxu0 %v1649_v0 }
 0x484   :  { %1651 = vmatprep.subr.bf16.mxu0 %v2184_v21 }
 0x487   :  { %1653 = vmatpush3.bf16.msra.mxu0 %v1652_v5 }
 0x488   :  { %1654 = vmatprep.subr.bf16.mxu0 %v2184_v21 }
 0x48b   :  { %1656 = vmatpush3.bf16.msra.mxu0 %v1655_v11 }
 0x53d   :  { %v1446_v13 = vpop.f32.mrb[4].mxu0 }
 0x53e   :  { %v817_v14 = vadd.f32 %v1446_v13, %v1275_v12  ;;  %v811_v15 = vpop.f32.mrb[5].mxu0 }
 0x53f   :  { %v812_v18 = vadd.f32 %v1275_v12, %v811_v15 }
 0x540   :  { %v821_v23 = vmax.f32 %v817_v14, 0.0 }
 0x541   :  { %v820_v19 = vmax.f32 %v812_v18, 0.0  ;;  %v1024_v20 = vpop.f32.mrb[6].mxu0 }
 0x542   :  { %v1025_v24 = vadd.f32 %v1024_v20, %v2544_v4  ;;  %v1488_v26 = vpop.f32.mrb[7].mxu0  ;;  %v1128_v4 = vld [vmem:[#allocation29 + $0x30] sm:$0xff] }
 0x543   :  { %1479 = vmatprep.mubr.f32.mxu1 %v820_v19  ;;  %v1667_v37 = vpack.c.bf16 %v1129_v36, %v1128_v4 }
 0x544   :  { %1480 = vmatmul.mubr.f32.vlgmr.msra.gmra.mrb[6].mxu1 %v821_v23  ;;  %1522 = vmatmul.mubr.f32.vlgmr.msra.gmra.mrb[8].mxu0 %v1025_v24 }
 0x545   :  { %1659 = vmatpush3.bf16.msra.mxu1 %v1658_v22  ;;  %1556 = vmatprep.mubr.msk.f32.mxu1 %vm2183_vm3, %v2182_v3  ;;  %v1132_v3 = vld [vmem:[#allocation29 + $0x50] sm:$0xff] }
 0x546   :  { %1660 = vmatprep.subr.bf16.mxu1 %v2184_v21  ;;  %v1673_v42 = vpack.c.bf16 %v1133_v41, %v1132_v3 }
 0x549   :  { %1662 = vmatpush3.bf16.msra.mxu1 %v1661_v31 }
 0x54a   :  { %1663 = vmatprep.subr.bf16.mxu1 %v2184_v21 }
 0x54d   :  { %1665 = vmatpush3.bf16.msra.mxu1 %v1664_v34 }
 0x54e   :  { %1666 = vmatprep.subr.bf16.mxu1 %v2184_v21 }
 0x551   :  { %1668 = vmatpush3.bf16.msra.mxu1 %v1667_v37 }
 0x552   :  { %1669 = vmatprep.subr.bf16.mxu1 %v2184_v21 }
 0x555   :  { %1671 = vmatpush3.bf16.msra.mxu1 %v1670_v40 }
 0x556   :  { %1672 = vmatprep.subr.bf16.mxu1 %v2184_v21 }
 0x559   :  { %1674 = vmatpush3.bf16.msra.mxu1 %v1673_v42 }
 0x55a   :  { %1675 = vmatprep.subr.bf16.mxu1 %v2184_v21 }
 0x55d   :  { %1677 = vmatpush3.bf16.msra.mxu1 %v1676_v45 }
 0x55e   :  { %1678 = vmatprep.subr.bf16.mxu1 %v2184_v21 }
 0x561   :  { %1680 = vmatpush3.bf16.msra.mxu1 %v1679_v48 }
 0x617   :  { %v1481_v25 = vpop.f32.mrb[6].mxu1  ;;  %v1117_v52 = vpop.f32.mrb[8].mxu0 }
 0x618   :  { %v917_v27 = vadd.f32 %v1481_v25, %v1276_v49  ;;  %v911_v53 = vpop.f32.mrb[7].mxu1  ;;  %v1118_v35 = vadd.f32 %v1282_v50, %v1117_v52  ;;  %v1523_v29 = vpop.f32.mrb[9].mxu0 }
 0x619   :  { %v912_v54 = vadd.f32 %v1276_v49, %v911_v53 }
 0x61a   :  { %v921_v56 = vmax.f32 %v917_v27, 0.0  ;;  %v1121_v57 = vmax.f32 %v1118_v35, 0.0 }
 0x61b   :  { %v920_v59 = vmax.f32 %v912_v54, 0.0 }
 0x61c   :  { %v941_v21 = vmul.f32 %v1721_v55, %v921_v56  ;;  %1557 = vmatmul.mubr.f32.vlgmr.msra.gmra.mrb[8].mxu1 %v1121_v57 }
 0x61d   :  { %v940_v60 = vmul.f32 %v1720_v58, %v920_v59 }
 0x61e   :  { %943 = vst [vmem:[#allocation32 + $0x8] sm:$0xff] %v941_v21 }
 0x61f   :  { %942 = vst [vmem:[#allocation32] sm:$0xff] %v940_v60 }
 0x620   :  { %2107 = shalt.err (!%p2104_p0)
}
 0x621   :  { %s2108_s8 = scalar_lea.hbm %s2671_s18, 256 }
 0x622   :  { %p2109_p1 = scmp.ne.s32.totalorder %s2671_s18, %s2108_s8  ;;  %p2112_p2 = scmp.lt.u32.totalorder %s2108_s8, %s2671_s18 }
 0x624   :  { %p2114_p3 = pnand %p2112_p2, %p2109_p1 }
 0x626   :  { %2117 = shalt.err (!%p2114_p3)
}
 0x627   :  { %1228 = dma.vmem_to_hbm [thread:$0]  %s1223_s27, 256, %s2671_s18, [#allocation7], %s2168_s0, %s2168_s0, %s2169_s22   ;;  %v1283_v61 = vld [vmem:[#allocation31] ss:$0 sm:$0xff] }
 0x628   :  { %s2186_s23 = smov [#allocation33]  }
 0x629   :  { %s1235_s20 = sshll.u32 %s2186_s23, 4  ;;  %s1236_s20 = int_to_ptr.vmem [resolvable:$true] %s1235_s20 }
 0x62a   :  { %s2118_s6 = scalar_lea.vmem %s1236_s20, 128  ;;  %p2123_p5 = scmp.lt.s32.totalorder %s1236_s20, %s1236_s20 }
 0x62b   :  { %p2119_p4 = scmp.ne.s32.totalorder %s1236_s20, %s2118_s6  ;;  %p2124_p6 = scmp.lt.s32.totalorder %s2118_s6, %s2118_s6 }
 0x62d   :  { %p2125_p7 = por %p2124_p6, %p2123_p5 }
 0x62f   :  { %p2126_p8 = pnand %p2125_p7, %p2119_p4 }
 0x6ef   :  { %v1211_v62 = vpop.f32.mrb[8].mxu1 }
 0x6f0   :  { %v1212_v63 = vadd.f32 %v1283_v61, %v1211_v62  ;;  %v1558_v0 = vpop.f32.mrb[9].mxu1 }
 0x6f2   :  { %v1215_v1 = vmax.f32 %v1212_v63, 0.0 }
 0x6f4   :  { %1216 = vst [vmem:[#allocation33] sm:$0xff] %v1215_v1 }
 0x6f5   :  { %2129 = shalt.err (!%p2126_p8)
}
 0x6f6   :  { %s2130_s18 = scalar_lea.hbm %s2672_s19, 128 }
 0x6f7   :  { %p2131_p9 = scmp.ne.s32.totalorder %s2672_s19, %s2130_s18  ;;  %p2134_p10 = scmp.lt.u32.totalorder %s2130_s18, %s2672_s19 }
 0x6f9   :  { %p2136_p11 = pnand %p2134_p10, %p2131_p9 }
 0x6fb   :  { %2139 = shalt.err (!%p2136_p11)
}
 0x6fc   :  { %1238 = dma.vmem_to_hbm [thread:$0]  %s1236_s20, 128, %s2672_s19, [#allocation34]  }
 0x6fd   :  { %2158 = dma.done.wait [#allocation7], 256  }
 0x6fe   :  { %2159 = vsyncadd [#allocation7], 4294967040 }
 0x6ff   :  { %2160 = dma.done.wait [#allocation34], 128  }
 0x700   :  { %2161 = vsyncadd [#allocation34], 4294967168 }
 0x701   :  { %1245 = vsyncpa [#allocation6], 1 }
 0x702   :  { %1246 = vsyncpa [#allocation9], 1 }
 0x703   :  { %1247 = vsyncpa [#allocation12], 1 }
 0x704   :  { %1248 = vsyncpa [#allocation15], 1 }
 0x705   :  { %1249 = vsyncpa [#allocation18], 1 }
 0x706   :  { %1250 = vsyncpa [#allocation21], 1 }
 0x707   :  { %1251 = vsyncpa [#allocation24], 1 }
 0x708   :  { %1252 = vsyncpa [#allocation27], 1 }
 0x709   :  { %1253 = vsyncpa [#allocation30], 1 }
 0x70a   :  { %1254 = vsyncpa [#allocation7], 1 }
 0x70b   :  { %1255 = vsyncpa [#allocation34], 1 }

</bundles_post_ra>
